<compile_context>
chip_gen: v7x
topology: tpu7x:2x2x1
jax: 0.10.0
libtpu: 0.0.40
codegen_flags: <defaults>
</compile_context>

<pallas_src>
import jax
import jax.numpy as jnp
from jax.experimental import pallas as pl
from jax.experimental.pallas import tpu as pltpu


def _transformer_kernel(tok_ref, a_ref, w_e_ref, w_v_ref, w_u_ref, o_ref, emb_ref):
    """One grid step = one 128-wide output-vocab tile.

    tok_ref: (B*L,)  int32  SMEM (scalar prefetch) — flattened token ids
    a_ref:   (B, L)  f32    last row of the attention logits (a[:, -1, :])
    w_e_ref: (V, D)  f32    E.weight.T   (gather source, resident in VMEM)
    w_v_ref: (D, D)  bf16   V.weight.T
    w_u_ref: (D, TV) bf16   U.weight.T, current vocab tile
    o_ref:   (B, TV) f32    output tile (last sequence position per batch)
    emb_ref: (B*L, D) f32   VMEM scratch for the gathered E rows
    """
    Bp, L = a_ref.shape
    D = w_e_ref.shape[1]

    # Exact softmax over the single (last) attention row per batch.
    a = a_ref[...]
    a = a - jnp.max(a, axis=-1, keepdims=True)
    p = jnp.exp(a)
    s = p / jnp.sum(p, axis=-1, keepdims=True)                       # (Bp, L) f32

    # Row gather of E via SMEM scalar addressing: emb[r, :] = E[tok[r], :], r = b*L + l.
    # (Replaces the old B*L*V compare/select one-hot and the B*V^2 matmul.)
    for r in range(Bp * L):
        t = tok_ref[r]                                               # scalar token id
        emb_ref[pl.ds(r, 1), :] = w_e_ref[pl.ds(t, 1), :]

    # q[b, :] = sum_l s[b, l] * E[tok[b, l], :]
    emb3 = emb_ref[...].reshape(Bp, L, D)                            # (Bp, L, D) f32
    q = jnp.sum(emb3 * s[:, :, None], axis=1)                        # (Bp, D) f32

    # Low-rank chain on the MXU: (Bp, D) @ (D, D) @ (D, TV); bf16 inputs, f32 accumulate.
    h = jnp.dot(q.astype(w_v_ref.dtype), w_v_ref[...],
                preferred_element_type=jnp.float32)                  # (Bp, D)
    o_ref[...] = jnp.dot(h.astype(w_u_ref.dtype), w_u_ref[...],
                         preferred_element_type=jnp.float32)         # (Bp, TV)


def random_transformer_forward(tokens, a_last, w_e, w_v, w_u):
    """tokens: int32 [B, L]; a_last: f32 [B, L] (== a[:, -1, :] of the random attention);
    w_e: [V, D] (= E.weight.T), w_v: [D, D] (= V.weight.T), w_u: [D, V] (= U.weight.T).
    Returns f32 [B, V] — equivalent to the torch forward's `out` (return_attn=False)."""
    B, L = tokens.shape
    V, D = w_e.shape

    # Pad batch to a multiple of 8 sublanes (padded rows use token 0 / zero logits; sliced off).
    B_pad = max(8, ((B + 7) // 8) * 8)
    tok = jnp.zeros((B_pad, L), jnp.int32).at[:B].set(tokens.astype(jnp.int32))
    a = jnp.zeros((B_pad, L), jnp.float32).at[:B].set(a_last.astype(jnp.float32))
    tok_flat = tok.reshape(B_pad * L)

    # Output-vocab tile width (lane-dense, 128-aligned).
    tv = V if V <= 128 else 128
    assert V % tv == 0, "vocab size must be a multiple of the 128-lane tile"

    # Gather source stays f32 (robust dynamic row slicing); streamed weights go bf16.
    w_e_f = w_e.astype(jnp.float32)
    w_v_b = w_v.astype(jnp.bfloat16)
    w_u_b = w_u.astype(jnp.bfloat16)

    # TODO(synk): at very large vocab, also tile/stream the (V, D) E gather source (e.g. DMA
    # only the rows named by the scalar-prefetched tokens) instead of holding all of w_e in VMEM.
    out = pl.pallas_call(
        _transformer_kernel,
        out_shape=jax.ShapeDtypeStruct((B_pad, V), jnp.float32),
        grid_spec=pltpu.PrefetchScalarGridSpec(
            num_scalar_prefetch=1,                       # tokens -> SMEM
            grid=(V // tv,),                             # stream output-vocab tiles
            in_specs=[
                pl.BlockSpec((B_pad, L), lambda j, tok: (0, 0)),   # last attention row
                pl.BlockSpec((V, D),     lambda j, tok: (0, 0)),   # E (gather source)
                pl.BlockSpec((D, D),     lambda j, tok: (0, 0)),   # V
                pl.BlockSpec((D, tv),    lambda j, tok: (0, j)),   # U, streamed per tile
            ],
            out_specs=pl.BlockSpec((B_pad, tv), lambda j, tok: (0, j)),
            scratch_shapes=[pltpu.VMEM((B_pad * L, D), jnp.float32)],
        ),
        compiler_params=pltpu.CompilerParams(dimension_semantics=("parallel",)),
    )(tok_flat, a, w_e_f, w_v_b, w_u_b)
    return out[:B]


def reference_forward(tokens, a_last, w_e, w_v, w_u):
    V = w_e.shape[0]
    x = jax.nn.one_hot(tokens, V, dtype=jnp.float32)     # (B, L, V)
    v = x @ w_e @ w_v @ w_u                              # (B, L, V)
    s = jax.nn.softmax(a_last, axis=-1)                  # (B, L) == softmax(a, -1)[:, -1, :]
    return jnp.einsum("bl,blv->bv", s, v)                # (B, V)


if __name__ == "__main__":
    # Small deterministic setup: vocab=512 (DICTIONARY_SIZE stand-in), embed=64, B=2, L=8.
    VOCAB, EMBED, B, L = 512, 64, 2, 8

    key = jax.random.PRNGKey(0)
    k_tok, k_a, k_e, k_v, k_u = jax.random.split(key, 5)

    tokens = jax.random.randint(k_tok, (B, L), 0, VOCAB, dtype=jnp.int32)
    # The torch module draws randn(B, L, L) each forward but only its last row reaches the
    # output; we draw just that row deterministically and pass it in (same semantics).
    a_last = jax.random.normal(k_a, (B, L), dtype=jnp.float32)

    # Deterministic "Linear" weights, stored as [in, out] (i.e. torch weight transposed).
    w_e = jax.random.normal(k_e, (VOCAB, EMBED), dtype=jnp.float32) / jnp.sqrt(float(VOCAB))
    w_v = jax.random.normal(k_v, (EMBED, EMBED), dtype=jnp.float32) / jnp.sqrt(float(EMBED))
    w_u = jax.random.normal(k_u, (EMBED, VOCAB), dtype=jnp.float32) / jnp.sqrt(float(EMBED))

    out = jax.block_until_ready(
        random_transformer_forward(tokens, a_last, w_e, w_v, w_u))

    # Reference uses the same bf16-rounded streamed weights the kernel sees, so the comparison
    # checks the kernel math (gather + softmax + matmul chain) rather than bf16 quantization.
    w_v_q = w_v.astype(jnp.bfloat16).astype(jnp.float32)
    w_u_q = w_u.astype(jnp.bfloat16).astype(jnp.float32)
    ref = reference_forward(tokens, a_last, w_e, w_v_q, w_u_q)

    assert out.shape == (B, VOCAB), out.shape
    assert jnp.allclose(out, ref, atol=2e-3, rtol=1e-2), "mismatch vs JAX reference"
    print("KERNEL_OK")
</pallas_src>

<mosaic_0001>
module attributes {stable_mosaic.version = 11 : i64} {
  func.func @_transformer_kernel(%arg0: i32, %arg1: memref<64xi32, #tpu.memory_space<smem>>, %arg2: memref<8x8xf32, #tpu.memory_space<vmem>>, %arg3: memref<512x64xf32, #tpu.memory_space<vmem>>, %arg4: memref<64x64xbf16, #tpu.memory_space<vmem>>, %arg5: memref<64x128xbf16, #tpu.memory_space<vmem>>, %arg6: memref<8x128xf32, #tpu.memory_space<vmem>>, %arg7: memref<64x64xf32, #tpu.memory_space<vmem>>) attributes {dimension_semantics = [#tpu.dimension_semantics<parallel>], iteration_bounds = array<i64: 4>, scalar_prefetch = 1 : i64, scratch_operands = 1 : i64, tpu.core_type = #tpu.core_type<tc>, window_params = [{pipeline_mode = #tpu.pipeline_mode<synchronous>, transform_indices = @transform_0, window_bounds = array<i64: 8, 8>}, {pipeline_mode = #tpu.pipeline_mode<synchronous>, transform_indices = @transform_1, window_bounds = array<i64: 512, 64>}, {pipeline_mode = #tpu.pipeline_mode<synchronous>, transform_indices = @transform_2, window_bounds = array<i64: 64, 64>}, {transform_indices = @transform_3, window_bounds = array<i64: 64, 128>}, {transform_indices = @transform_4, window_bounds = array<i64: 8, 128>}]} {
    %c0 = arith.constant 0 : index
    %c0_0 = arith.constant 0 : index
    %0 = vector.load %arg2[%c0, %c0_0] : memref<8x8xf32, #tpu.memory_space<vmem>>, vector<8x8xf32>
    %cst = arith.constant dense<0xFF800000> : vector<8xf32>
    %1 = vector.multi_reduction <maximumf>, %0, %cst [1] : vector<8x8xf32> to vector<8xf32>
    %2 = vector.shape_cast %1 : vector<8xf32> to vector<8x1xf32>
    %3 = vector.broadcast %2 : vector<8x1xf32> to vector<8x8xf32>
    %4 = arith.subf %0, %3 : vector<8x8xf32>
    %5 = math.exp %4 : vector<8x8xf32>
    %cst_1 = arith.constant dense<0.000000e+00> : vector<8xf32>
    %6 = vector.multi_reduction <add>, %5, %cst_1 [1] : vector<8x8xf32> to vector<8xf32>
    %7 = vector.shape_cast %6 : vector<8xf32> to vector<8x1xf32>
    %8 = vector.broadcast %7 : vector<8x1xf32> to vector<8x8xf32>
    %9 = arith.divf %5, %8 : vector<8x8xf32>
    %c0_2 = arith.constant 0 : index
    %10 = memref.load %arg1[%c0_2] : memref<64xi32, #tpu.memory_space<smem>>
    %11 = arith.index_cast %10 : i32 to index
    %c0_3 = arith.constant 0 : index
    %12 = vector.load %arg3[%11, %c0_3] : memref<512x64xf32, #tpu.memory_space<vmem>>, vector<1x64xf32>
    %c0_4 = arith.constant 0 : index
    %c0_5 = arith.constant 0 : index
    %13 = vector.load %arg7[%c0_4, %c0_5] : memref<64x64xf32, #tpu.memory_space<vmem>>, vector<1x64xf32>
    tpu.vector_store %arg7[%c0_4, %c0_5], %12 {strides = array<i32>} : memref<64x64xf32, #tpu.memory_space<vmem>>, vector<1x64xf32>,
    %c1 = arith.constant 1 : index
    %14 = memref.load %arg1[%c1] : memref<64xi32, #tpu.memory_space<smem>>
    %15 = arith.index_cast %14 : i32 to index
    %c0_6 = arith.constant 0 : index
    %16 = vector.load %arg3[%15, %c0_6] : memref<512x64xf32, #tpu.memory_space<vmem>>, vector<1x64xf32>
    %c1_7 = arith.constant 1 : index
    %c0_8 = arith.constant 0 : index
    %17 = vector.load %arg7[%c1_7, %c0_8] : memref<64x64xf32, #tpu.memory_space<vmem>>, vector<1x64xf32>
    tpu.vector_store %arg7[%c1_7, %c0_8], %16 {strides = array<i32>} : memref<64x64xf32, #tpu.memory_space<vmem>>, vector<1x64xf32>,
    %c2 = arith.constant 2 : index
    %18 = memref.load %arg1[%c2] : memref<64xi32, #tpu.memory_space<smem>>
    %19 = arith.index_cast %18 : i32 to index
    %c0_9 = arith.constant 0 : index
    %20 = vector.load %arg3[%19, %c0_9] : memref<512x64xf32, #tpu.memory_space<vmem>>, vector<1x64xf32>
    %c2_10 = arith.constant 2 : index
    %c0_11 = arith.constant 0 : index
    %21 = vector.load %arg7[%c2_10, %c0_11] : memref<64x64xf32, #tpu.memory_space<vmem>>, vector<1x64xf32>
    tpu.vector_store %arg7[%c2_10, %c0_11], %20 {strides = array<i32>} : memref<64x64xf32, #tpu.memory_space<vmem>>, vector<1x64xf32>,
    %c3 = arith.constant 3 : index
    %22 = memref.load %arg1[%c3] : memref<64xi32, #tpu.memory_space<smem>>
    %23 = arith.index_cast %22 : i32 to index
    %c0_12 = arith.constant 0 : index
    %24 = vector.load %arg3[%23, %c0_12] : memref<512x64xf32, #tpu.memory_space<vmem>>, vector<1x64xf32>
    %c3_13 = arith.constant 3 : index
    %c0_14 = arith.constant 0 : index
    %25 = vector.load %arg7[%c3_13, %c0_14] : memref<64x64xf32, #tpu.memory_space<vmem>>, vector<1x64xf32>
    tpu.vector_store %arg7[%c3_13, %c0_14], %24 {strides = array<i32>} : memref<64x64xf32, #tpu.memory_space<vmem>>, vector<1x64xf32>,
    %c4 = arith.constant 4 : index
    %26 = memref.load %arg1[%c4] : memref<64xi32, #tpu.memory_space<smem>>
    %27 = arith.index_cast %26 : i32 to index
    %c0_15 = arith.constant 0 : index
    %28 = vector.load %arg3[%27, %c0_15] : memref<512x64xf32, #tpu.memory_space<vmem>>, vector<1x64xf32>
    %c4_16 = arith.constant 4 : index
    %c0_17 = arith.constant 0 : index
    %29 = vector.load %arg7[%c4_16, %c0_17] : memref<64x64xf32, #tpu.memory_space<vmem>>, vector<1x64xf32>
    tpu.vector_store %arg7[%c4_16, %c0_17], %28 {strides = array<i32>} : memref<64x64xf32, #tpu.memory_space<vmem>>, vector<1x64xf32>,
    %c5 = arith.constant 5 : index
    %30 = memref.load %arg1[%c5] : memref<64xi32, #tpu.memory_space<smem>>
    %31 = arith.index_cast %30 : i32 to index
    %c0_18 = arith.constant 0 : index
    %32 = vector.load %arg3[%31, %c0_18] : memref<512x64xf32, #tpu.memory_space<vmem>>, vector<1x64xf32>
    %c5_19 = arith.constant 5 : index
    %c0_20 = arith.constant 0 : index
    %33 = vector.load %arg7[%c5_19, %c0_20] : memref<64x64xf32, #tpu.memory_space<vmem>>, vector<1x64xf32>
    tpu.vector_store %arg7[%c5_19, %c0_20], %32 {strides = array<i32>} : memref<64x64xf32, #tpu.memory_space<vmem>>, vector<1x64xf32>,
    %c6 = arith.constant 6 : index
    %34 = memref.load %arg1[%c6] : memref<64xi32, #tpu.memory_space<smem>>
    %35 = arith.index_cast %34 : i32 to index
    %c0_21 = arith.constant 0 : index
    %36 = vector.load %arg3[%35, %c0_21] : memref<512x64xf32, #tpu.memory_space<vmem>>, vector<1x64xf32>
    %c6_22 = arith.constant 6 : index
    %c0_23 = arith.constant 0 : index
    %37 = vector.load %arg7[%c6_22, %c0_23] : memref<64x64xf32, #tpu.memory_space<vmem>>, vector<1x64xf32>
    tpu.vector_store %arg7[%c6_22, %c0_23], %36 {strides = array<i32>} : memref<64x64xf32, #tpu.memory_space<vmem>>, vector<1x64xf32>,
    %c7 = arith.constant 7 : index
    %38 = memref.load %arg1[%c7] : memref<64xi32, #tpu.memory_space<smem>>
    %39 = arith.index_cast %38 : i32 to index
    %c0_24 = arith.constant 0 : index
    %40 = vector.load %arg3[%39, %c0_24] : memref<512x64xf32, #tpu.memory_space<vmem>>, vector<1x64xf32>
    %c7_25 = arith.constant 7 : index
    %c0_26 = arith.constant 0 : index
    %41 = vector.load %arg7[%c7_25, %c0_26] : memref<64x64xf32, #tpu.memory_space<vmem>>, vector<1x64xf32>
    tpu.vector_store %arg7[%c7_25, %c0_26], %40 {strides = array<i32>} : memref<64x64xf32, #tpu.memory_space<vmem>>, vector<1x64xf32>,
    %c8 = arith.constant 8 : index
    %42 = memref.load %arg1[%c8] : memref<64xi32, #tpu.memory_space<smem>>
    %43 = arith.index_cast %42 : i32 to index
    %c0_27 = arith.constant 0 : index
    %44 = vector.load %arg3[%43, %c0_27] : memref<512x64xf32, #tpu.memory_space<vmem>>, vector<1x64xf32>
    %c8_28 = arith.constant 8 : index
    %c0_29 = arith.constant 0 : index
    %45 = vector.load %arg7[%c8_28, %c0_29] : memref<64x64xf32, #tpu.memory_space<vmem>>, vector<1x64xf32>
    tpu.vector_store %arg7[%c8_28, %c0_29], %44 {strides = array<i32>} : memref<64x64xf32, #tpu.memory_space<vmem>>, vector<1x64xf32>,
    %c9 = arith.constant 9 : index
    %46 = memref.load %arg1[%c9] : memref<64xi32, #tpu.memory_space<smem>>
    %47 = arith.index_cast %46 : i32 to index
    %c0_30 = arith.constant 0 : index
    %48 = vector.load %arg3[%47, %c0_30] : memref<512x64xf32, #tpu.memory_space<vmem>>, vector<1x64xf32>
    %c9_31 = arith.constant 9 : index
    %c0_32 = arith.constant 0 : index
    %49 = vector.load %arg7[%c9_31, %c0_32] : memref<64x64xf32, #tpu.memory_space<vmem>>, vector<1x64xf32>
    tpu.vector_store %arg7[%c9_31, %c0_32], %48 {strides = array<i32>} : memref<64x64xf32, #tpu.memory_space<vmem>>, vector<1x64xf32>,
    %c10 = arith.constant 10 : index
    %50 = memref.load %arg1[%c10] : memref<64xi32, #tpu.memory_space<smem>>
    %51 = arith.index_cast %50 : i32 to index
    %c0_33 = arith.constant 0 : index
    %52 = vector.load %arg3[%51, %c0_33] : memref<512x64xf32, #tpu.memory_space<vmem>>, vector<1x64xf32>
    %c10_34 = arith.constant 10 : index
    %c0_35 = arith.constant 0 : index
    %53 = vector.load %arg7[%c10_34, %c0_35] : memref<64x64xf32, #tpu.memory_space<vmem>>, vector<1x64xf32>
    tpu.vector_store %arg7[%c10_34, %c0_35], %52 {strides = array<i32>} : memref<64x64xf32, #tpu.memory_space<vmem>>, vector<1x64xf32>,
    %c11 = arith.constant 11 : index
    %54 = memref.load %arg1[%c11] : memref<64xi32, #tpu.memory_space<smem>>
    %55 = arith.index_cast %54 : i32 to index
    %c0_36 = arith.constant 0 : index
    %56 = vector.load %arg3[%55, %c0_36] : memref<512x64xf32, #tpu.memory_space<vmem>>, vector<1x64xf32>
    %c11_37 = arith.constant 11 : index
    %c0_38 = arith.constant 0 : index
    %57 = vector.load %arg7[%c11_37, %c0_38] : memref<64x64xf32, #tpu.memory_space<vmem>>, vector<1x64xf32>
    tpu.vector_store %arg7[%c11_37, %c0_38], %56 {strides = array<i32>} : memref<64x64xf32, #tpu.memory_space<vmem>>, vector<1x64xf32>,
    %c12 = arith.constant 12 : index
    %58 = memref.load %arg1[%c12] : memref<64xi32, #tpu.memory_space<smem>>
    %59 = arith.index_cast %58 : i32 to index
    %c0_39 = arith.constant 0 : index
    %60 = vector.load %arg3[%59, %c0_39] : memref<512x64xf32, #tpu.memory_space<vmem>>, vector<1x64xf32>
    %c12_40 = arith.constant 12 : index
    %c0_41 = arith.constant 0 : index
    %61 = vector.load %arg7[%c12_40, %c0_41] : memref<64x64xf32, #tpu.memory_space<vmem>>, vector<1x64xf32>
    tpu.vector_store %arg7[%c12_40, %c0_41], %60 {strides = array<i32>} : memref<64x64xf32, #tpu.memory_space<vmem>>, vector<1x64xf32>,
    %c13 = arith.constant 13 : index
    %62 = memref.load %arg1[%c13] : memref<64xi32, #tpu.memory_space<smem>>
    %63 = arith.index_cast %62 : i32 to index
    %c0_42 = arith.constant 0 : index
    %64 = vector.load %arg3[%63, %c0_42] : memref<512x64xf32, #tpu.memory_space<vmem>>, vector<1x64xf32>
    %c13_43 = arith.constant 13 : index
    %c0_44 = arith.constant 0 : index
    %65 = vector.load %arg7[%c13_43, %c0_44] : memref<64x64xf32, #tpu.memory_space<vmem>>, vector<1x64xf32>
    tpu.vector_store %arg7[%c13_43, %c0_44], %64 {strides = array<i32>} : memref<64x64xf32, #tpu.memory_space<vmem>>, vector<1x64xf32>,
    %c14 = arith.constant 14 : index
    %66 = memref.load %arg1[%c14] : memref<64xi32, #tpu.memory_space<smem>>
    %67 = arith.index_cast %66 : i32 to index
    %c0_45 = arith.constant 0 : index
    %68 = vector.load %arg3[%67, %c0_45] : memref<512x64xf32, #tpu.memory_space<vmem>>, vector<1x64xf32>
    %c14_46 = arith.constant 14 : index
    %c0_47 = arith.constant 0 : index
    %69 = vector.load %arg7[%c14_46, %c0_47] : memref<64x64xf32, #tpu.memory_space<vmem>>, vector<1x64xf32>
    tpu.vector_store %arg7[%c14_46, %c0_47], %68 {strides = array<i32>} : memref<64x64xf32, #tpu.memory_space<vmem>>, vector<1x64xf32>,
    %c15 = arith.constant 15 : index
    %70 = memref.load %arg1[%c15] : memref<64xi32, #tpu.memory_space<smem>>
    %71 = arith.index_cast %70 : i32 to index
    %c0_48 = arith.constant 0 : index
    %72 = vector.load %arg3[%71, %c0_48] : memref<512x64xf32, #tpu.memory_space<vmem>>, vector<1x64xf32>
    %c15_49 = arith.constant 15 : index
    %c0_50 = arith.constant 0 : index
    %73 = vector.load %arg7[%c15_49, %c0_50] : memref<64x64xf32, #tpu.memory_space<vmem>>, vector<1x64xf32>
    tpu.vector_store %arg7[%c15_49, %c0_50], %72 {strides = array<i32>} : memref<64x64xf32, #tpu.memory_space<vmem>>, vector<1x64xf32>,
    %c16 = arith.constant 16 : index
    %74 = memref.load %arg1[%c16] : memref<64xi32, #tpu.memory_space<smem>>
    %75 = arith.index_cast %74 : i32 to index
    %c0_51 = arith.constant 0 : index
    %76 = vector.load %arg3[%75, %c0_51] : memref<512x64xf32, #tpu.memory_space<vmem>>, vector<1x64xf32>
    %c16_52 = arith.constant 16 : index
    %c0_53 = arith.constant 0 : index
    %77 = vector.load %arg7[%c16_52, %c0_53] : memref<64x64xf32, #tpu.memory_space<vmem>>, vector<1x64xf32>
    tpu.vector_store %arg7[%c16_52, %c0_53], %76 {strides = array<i32>} : memref<64x64xf32, #tpu.memory_space<vmem>>, vector<1x64xf32>,
    %c17 = arith.constant 17 : index
    %78 = memref.load %arg1[%c17] : memref<64xi32, #tpu.memory_space<smem>>
    %79 = arith.index_cast %78 : i32 to index
    %c0_54 = arith.constant 0 : index
    %80 = vector.load %arg3[%79, %c0_54] : memref<512x64xf32, #tpu.memory_space<vmem>>, vector<1x64xf32>
    %c17_55 = arith.constant 17 : index
    %c0_56 = arith.constant 0 : index
    %81 = vector.load %arg7[%c17_55, %c0_56] : memref<64x64xf32, #tpu.memory_space<vmem>>, vector<1x64xf32>
    tpu.vector_store %arg7[%c17_55, %c0_56], %80 {strides = array<i32>} : memref<64x64xf32, #tpu.memory_space<vmem>>, vector<1x64xf32>,
    %c18 = arith.constant 18 : index
    %82 = memref.load %arg1[%c18] : memref<64xi32, #tpu.memory_space<smem>>
    %83 = arith.index_cast %82 : i32 to index
    %c0_57 = arith.constant 0 : index
    %84 = vector.load %arg3[%83, %c0_57] : memref<512x64xf32, #tpu.memory_space<vmem>>, vector<1x64xf32>
    %c18_58 = arith.constant 18 : index
    %c0_59 = arith.constant 0 : index
    %85 = vector.load %arg7[%c18_58, %c0_59] : memref<64x64xf32, #tpu.memory_space<vmem>>, vector<1x64xf32>
    tpu.vector_store %arg7[%c18_58, %c0_59], %84 {strides = array<i32>} : memref<64x64xf32, #tpu.memory_space<vmem>>, vector<1x64xf32>,
    %c19 = arith.constant 19 : index
    %86 = memref.load %arg1[%c19] : memref<64xi32, #tpu.memory_space<smem>>
    %87 = arith.index_cast %86 : i32 to index
    %c0_60 = arith.constant 0 : index
    %88 = vector.load %arg3[%87, %c0_60] : memref<512x64xf32, #tpu.memory_space<vmem>>, vector<1x64xf32>
    %c19_61 = arith.constant 19 : index
    %c0_62 = arith.constant 0 : index
    %89 = vector.load %arg7[%c19_61, %c0_62] : memref<64x64xf32, #tpu.memory_space<vmem>>, vector<1x64xf32>
    tpu.vector_store %arg7[%c19_61, %c0_62], %88 {strides = array<i32>} : memref<64x64xf32, #tpu.memory_space<vmem>>, vector<1x64xf32>,
    %c20 = arith.constant 20 : index
    %90 = memref.load %arg1[%c20] : memref<64xi32, #tpu.memory_space<smem>>
    %91 = arith.index_cast %90 : i32 to index
    %c0_63 = arith.constant 0 : index
    %92 = vector.load %arg3[%91, %c0_63] : memref<512x64xf32, #tpu.memory_space<vmem>>, vector<1x64xf32>
    %c20_64 = arith.constant 20 : index
    %c0_65 = arith.constant 0 : index
    %93 = vector.load %arg7[%c20_64, %c0_65] : memref<64x64xf32, #tpu.memory_space<vmem>>, vector<1x64xf32>
    tpu.vector_store %arg7[%c20_64, %c0_65], %92 {strides = array<i32>} : memref<64x64xf32, #tpu.memory_space<vmem>>, vector<1x64xf32>,
    %c21 = arith.constant 21 : index
    %94 = memref.load %arg1[%c21] : memref<64xi32, #tpu.memory_space<smem>>
    %95 = arith.index_cast %94 : i32 to index
    %c0_66 = arith.constant 0 : index
    %96 = vector.load %arg3[%95, %c0_66] : memref<512x64xf32, #tpu.memory_space<vmem>>, vector<1x64xf32>
    %c21_67 = arith.constant 21 : index
    %c0_68 = arith.constant 0 : index
    %97 = vector.load %arg7[%c21_67, %c0_68] : memref<64x64xf32, #tpu.memory_space<vmem>>, vector<1x64xf32>
    tpu.vector_store %arg7[%c21_67, %c0_68], %96 {strides = array<i32>} : memref<64x64xf32, #tpu.memory_space<vmem>>, vector<1x64xf32>,
    %c22 = arith.constant 22 : index
    %98 = memref.load %arg1[%c22] : memref<64xi32, #tpu.memory_space<smem>>
    %99 = arith.index_cast %98 : i32 to index
    %c0_69 = arith.constant 0 : index
    %100 = vector.load %arg3[%99, %c0_69] : memref<512x64xf32, #tpu.memory_space<vmem>>, vector<1x64xf32>
    %c22_70 = arith.constant 22 : index
    %c0_71 = arith.constant 0 : index
    %101 = vector.load %arg7[%c22_70, %c0_71] : memref<64x64xf32, #tpu.memory_space<vmem>>, vector<1x64xf32>
    tpu.vector_store %arg7[%c22_70, %c0_71], %100 {strides = array<i32>} : memref<64x64xf32, #tpu.memory_space<vmem>>, vector<1x64xf32>,
    %c23 = arith.constant 23 : index
    %102 = memref.load %arg1[%c23] : memref<64xi32, #tpu.memory_space<smem>>
    %103 = arith.index_cast %102 : i32 to index
    %c0_72 = arith.constant 0 : index
    %104 = vector.load %arg3[%103, %c0_72] : memref<512x64xf32, #tpu.memory_space<vmem>>, vector<1x64xf32>
    %c23_73 = arith.constant 23 : index
    %c0_74 = arith.constant 0 : index
    %105 = vector.load %arg7[%c23_73, %c0_74] : memref<64x64xf32, #tpu.memory_space<vmem>>, vector<1x64xf32>
    tpu.vector_store %arg7[%c23_73, %c0_74], %104 {strides = array<i32>} : memref<64x64xf32, #tpu.memory_space<vmem>>, vector<1x64xf32>,
    %c24 = arith.constant 24 : index
    %106 = memref.load %arg1[%c24] : memref<64xi32, #tpu.memory_space<smem>>
    %107 = arith.index_cast %106 : i32 to index
    %c0_75 = arith.constant 0 : index
    %108 = vector.load %arg3[%107, %c0_75] : memref<512x64xf32, #tpu.memory_space<vmem>>, vector<1x64xf32>
    %c24_76 = arith.constant 24 : index
    %c0_77 = arith.constant 0 : index
    %109 = vector.load %arg7[%c24_76, %c0_77] : memref<64x64xf32, #tpu.memory_space<vmem>>, vector<1x64xf32>
    tpu.vector_store %arg7[%c24_76, %c0_77], %108 {strides = array<i32>} : memref<64x64xf32, #tpu.memory_space<vmem>>, vector<1x64xf32>,
    %c25 = arith.constant 25 : index
    %110 = memref.load %arg1[%c25] : memref<64xi32, #tpu.memory_space<smem>>
    %111 = arith.index_cast %110 : i32 to index
    %c0_78 = arith.constant 0 : index
    %112 = vector.load %arg3[%111, %c0_78] : memref<512x64xf32, #tpu.memory_space<vmem>>, vector<1x64xf32>
    %c25_79 = arith.constant 25 : index
    %c0_80 = arith.constant 0 : index
    %113 = vector.load %arg7[%c25_79, %c0_80] : memref<64x64xf32, #tpu.memory_space<vmem>>, vector<1x64xf32>
    tpu.vector_store %arg7[%c25_79, %c0_80], %112 {strides = array<i32>} : memref<64x64xf32, #tpu.memory_space<vmem>>, vector<1x64xf32>,
    %c26 = arith.constant 26 : index
    %114 = memref.load %arg1[%c26] : memref<64xi32, #tpu.memory_space<smem>>
    %115 = arith.index_cast %114 : i32 to index
    %c0_81 = arith.constant 0 : index
    %116 = vector.load %arg3[%115, %c0_81] : memref<512x64xf32, #tpu.memory_space<vmem>>, vector<1x64xf32>
    %c26_82 = arith.constant 26 : index
    %c0_83 = arith.constant 0 : index
    %117 = vector.load %arg7[%c26_82, %c0_83] : memref<64x64xf32, #tpu.memory_space<vmem>>, vector<1x64xf32>
    tpu.vector_store %arg7[%c26_82, %c0_83], %116 {strides = array<i32>} : memref<64x64xf32, #tpu.memory_space<vmem>>, vector<1x64xf32>,
    %c27 = arith.constant 27 : index
    %118 = memref.load %arg1[%c27] : memref<64xi32, #tpu.memory_space<smem>>
    %119 = arith.index_cast %118 : i32 to index
    %c0_84 = arith.constant 0 : index
    %120 = vector.load %arg3[%119, %c0_84] : memref<512x64xf32, #tpu.memory_space<vmem>>, vector<1x64xf32>
    %c27_85 = arith.constant 27 : index
    %c0_86 = arith.constant 0 : index
    %121 = vector.load %arg7[%c27_85, %c0_86] : memref<64x64xf32, #tpu.memory_space<vmem>>, vector<1x64xf32>
    tpu.vector_store %arg7[%c27_85, %c0_86], %120 {strides = array<i32>} : memref<64x64xf32, #tpu.memory_space<vmem>>, vector<1x64xf32>,
    %c28 = arith.constant 28 : index
    %122 = memref.load %arg1[%c28] : memref<64xi32, #tpu.memory_space<smem>>
    %123 = arith.index_cast %122 : i32 to index
    %c0_87 = arith.constant 0 : index
    %124 = vector.load %arg3[%123, %c0_87] : memref<512x64xf32, #tpu.memory_space<vmem>>, vector<1x64xf32>
    %c28_88 = arith.constant 28 : index
    %c0_89 = arith.constant 0 : index
    %125 = vector.load %arg7[%c28_88, %c0_89] : memref<64x64xf32, #tpu.memory_space<vmem>>, vector<1x64xf32>
    tpu.vector_store %arg7[%c28_88, %c0_89], %124 {strides = array<i32>} : memref<64x64xf32, #tpu.memory_space<vmem>>, vector<1x64xf32>,
    %c29 = arith.constant 29 : index
    %126 = memref.load %arg1[%c29] : memref<64xi32, #tpu.memory_space<smem>>
    %127 = arith.index_cast %126 : i32 to index
    %c0_90 = arith.constant 0 : index
    %128 = vector.load %arg3[%127, %c0_90] : memref<512x64xf32, #tpu.memory_space<vmem>>, vector<1x64xf32>
    %c29_91 = arith.constant 29 : index
    %c0_92 = arith.constant 0 : index
    %129 = vector.load %arg7[%c29_91, %c0_92] : memref<64x64xf32, #tpu.memory_space<vmem>>, vector<1x64xf32>
    tpu.vector_store %arg7[%c29_91, %c0_92], %128 {strides = array<i32>} : memref<64x64xf32, #tpu.memory_space<vmem>>, vector<1x64xf32>,
    %c30 = arith.constant 30 : index
    %130 = memref.load %arg1[%c30] : memref<64xi32, #tpu.memory_space<smem>>
    %131 = arith.index_cast %130 : i32 to index
    %c0_93 = arith.constant 0 : index
    %132 = vector.load %arg3[%131, %c0_93] : memref<512x64xf32, #tpu.memory_space<vmem>>, vector<1x64xf32>
    %c30_94 = arith.constant 30 : index
    %c0_95 = arith.constant 0 : index
    %133 = vector.load %arg7[%c30_94, %c0_95] : memref<64x64xf32, #tpu.memory_space<vmem>>, vector<1x64xf32>
    tpu.vector_store %arg7[%c30_94, %c0_95], %132 {strides = array<i32>} : memref<64x64xf32, #tpu.memory_space<vmem>>, vector<1x64xf32>,
    %c31 = arith.constant 31 : index
    %134 = memref.load %arg1[%c31] : memref<64xi32, #tpu.memory_space<smem>>
    %135 = arith.index_cast %134 : i32 to index
    %c0_96 = arith.constant 0 : index
    %136 = vector.load %arg3[%135, %c0_96] : memref<512x64xf32, #tpu.memory_space<vmem>>, vector<1x64xf32>
    %c31_97 = arith.constant 31 : index
    %c0_98 = arith.constant 0 : index
    %137 = vector.load %arg7[%c31_97, %c0_98] : memref<64x64xf32, #tpu.memory_space<vmem>>, vector<1x64xf32>
    tpu.vector_store %arg7[%c31_97, %c0_98], %136 {strides = array<i32>} : memref<64x64xf32, #tpu.memory_space<vmem>>, vector<1x64xf32>,
    %c32 = arith.constant 32 : index
    %138 = memref.load %arg1[%c32] : memref<64xi32, #tpu.memory_space<smem>>
    %139 = arith.index_cast %138 : i32 to index
    %c0_99 = arith.constant 0 : index
    %140 = vector.load %arg3[%139, %c0_99] : memref<512x64xf32, #tpu.memory_space<vmem>>, vector<1x64xf32>
    %c32_100 = arith.constant 32 : index
    %c0_101 = arith.constant 0 : index
    %141 = vector.load %arg7[%c32_100, %c0_101] : memref<64x64xf32, #tpu.memory_space<vmem>>, vector<1x64xf32>
    tpu.vector_store %arg7[%c32_100, %c0_101], %140 {strides = array<i32>} : memref<64x64xf32, #tpu.memory_space<vmem>>, vector<1x64xf32>,
    %c33 = arith.constant 33 : index
    %142 = memref.load %arg1[%c33] : memref<64xi32, #tpu.memory_space<smem>>
    %143 = arith.index_cast %142 : i32 to index
    %c0_102 = arith.constant 0 : index
    %144 = vector.load %arg3[%143, %c0_102] : memref<512x64xf32, #tpu.memory_space<vmem>>, vector<1x64xf32>
    %c33_103 = arith.constant 33 : index
    %c0_104 = arith.constant 0 : index
    %145 = vector.load %arg7[%c33_103, %c0_104] : memref<64x64xf32, #tpu.memory_space<vmem>>, vector<1x64xf32>
    tpu.vector_store %arg7[%c33_103, %c0_104], %144 {strides = array<i32>} : memref<64x64xf32, #tpu.memory_space<vmem>>, vector<1x64xf32>,
    %c34 = arith.constant 34 : index
    %146 = memref.load %arg1[%c34] : memref<64xi32, #tpu.memory_space<smem>>
    %147 = arith.index_cast %146 : i32 to index
    %c0_105 = arith.constant 0 : index
    %148 = vector.load %arg3[%147, %c0_105] : memref<512x64xf32, #tpu.memory_space<vmem>>, vector<1x64xf32>
    %c34_106 = arith.constant 34 : index
    %c0_107 = arith.constant 0 : index
    %149 = vector.load %arg7[%c34_106, %c0_107] : memref<64x64xf32, #tpu.memory_space<vmem>>, vector<1x64xf32>
    tpu.vector_store %arg7[%c34_106, %c0_107], %148 {strides = array<i32>} : memref<64x64xf32, #tpu.memory_space<vmem>>, vector<1x64xf32>,
    %c35 = arith.constant 35 : index
    %150 = memref.load %arg1[%c35] : memref<64xi32, #tpu.memory_space<smem>>
    %151 = arith.index_cast %150 : i32 to index
    %c0_108 = arith.constant 0 : index
    %152 = vector.load %arg3[%151, %c0_108] : memref<512x64xf32, #tpu.memory_space<vmem>>, vector<1x64xf32>
    %c35_109 = arith.constant 35 : index
    %c0_110 = arith.constant 0 : index
    %153 = vector.load %arg7[%c35_109, %c0_110] : memref<64x64xf32, #tpu.memory_space<vmem>>, vector<1x64xf32>
    tpu.vector_store %arg7[%c35_109, %c0_110], %152 {strides = array<i32>} : memref<64x64xf32, #tpu.memory_space<vmem>>, vector<1x64xf32>,
    %c36 = arith.constant 36 : index
    %154 = memref.load %arg1[%c36] : memref<64xi32, #tpu.memory_space<smem>>
    %155 = arith.index_cast %154 : i32 to index
    %c0_111 = arith.constant 0 : index
    %156 = vector.load %arg3[%155, %c0_111] : memref<512x64xf32, #tpu.memory_space<vmem>>, vector<1x64xf32>
    %c36_112 = arith.constant 36 : index
    %c0_113 = arith.constant 0 : index
    %157 = vector.load %arg7[%c36_112, %c0_113] : memref<64x64xf32, #tpu.memory_space<vmem>>, vector<1x64xf32>
    tpu.vector_store %arg7[%c36_112, %c0_113], %156 {strides = array<i32>} : memref<64x64xf32, #tpu.memory_space<vmem>>, vector<1x64xf32>,
    %c37 = arith.constant 37 : index
    %158 = memref.load %arg1[%c37] : memref<64xi32, #tpu.memory_space<smem>>
    %159 = arith.index_cast %158 : i32 to index
    %c0_114 = arith.constant 0 : index
    %160 = vector.load %arg3[%159, %c0_114] : memref<512x64xf32, #tpu.memory_space<vmem>>, vector<1x64xf32>
    %c37_115 = arith.constant 37 : index
    %c0_116 = arith.constant 0 : index
    %161 = vector.load %arg7[%c37_115, %c0_116] : memref<64x64xf32, #tpu.memory_space<vmem>>, vector<1x64xf32>
    tpu.vector_store %arg7[%c37_115, %c0_116], %160 {strides = array<i32>} : memref<64x64xf32, #tpu.memory_space<vmem>>, vector<1x64xf32>,
    %c38 = arith.constant 38 : index
    %162 = memref.load %arg1[%c38] : memref<64xi32, #tpu.memory_space<smem>>
    %163 = arith.index_cast %162 : i32 to index
    %c0_117 = arith.constant 0 : index
    %164 = vector.load %arg3[%163, %c0_117] : memref<512x64xf32, #tpu.memory_space<vmem>>, vector<1x64xf32>
    %c38_118 = arith.constant 38 : index
    %c0_119 = arith.constant 0 : index
    %165 = vector.load %arg7[%c38_118, %c0_119] : memref<64x64xf32, #tpu.memory_space<vmem>>, vector<1x64xf32>
    tpu.vector_store %arg7[%c38_118, %c0_119], %164 {strides = array<i32>} : memref<64x64xf32, #tpu.memory_space<vmem>>, vector<1x64xf32>,
    %c39 = arith.constant 39 : index
    %166 = memref.load %arg1[%c39] : memref<64xi32, #tpu.memory_space<smem>>
    %167 = arith.index_cast %166 : i32 to index
    %c0_120 = arith.constant 0 : index
    %168 = vector.load %arg3[%167, %c0_120] : memref<512x64xf32, #tpu.memory_space<vmem>>, vector<1x64xf32>
    %c39_121 = arith.constant 39 : index
    %c0_122 = arith.constant 0 : index
    %169 = vector.load %arg7[%c39_121, %c0_122] : memref<64x64xf32, #tpu.memory_space<vmem>>, vector<1x64xf32>
    tpu.vector_store %arg7[%c39_121, %c0_122], %168 {strides = array<i32>} : memref<64x64xf32, #tpu.memory_space<vmem>>, vector<1x64xf32>,
    %c40 = arith.constant 40 : index
    %170 = memref.load %arg1[%c40] : memref<64xi32, #tpu.memory_space<smem>>
    %171 = arith.index_cast %170 : i32 to index
    %c0_123 = arith.constant 0 : index
    %172 = vector.load %arg3[%171, %c0_123] : memref<512x64xf32, #tpu.memory_space<vmem>>, vector<1x64xf32>
    %c40_124 = arith.constant 40 : index
    %c0_125 = arith.constant 0 : index
    %173 = vector.load %arg7[%c40_124, %c0_125] : memref<64x64xf32, #tpu.memory_space<vmem>>, vector<1x64xf32>
    tpu.vector_store %arg7[%c40_124, %c0_125], %172 {strides = array<i32>} : memref<64x64xf32, #tpu.memory_space<vmem>>, vector<1x64xf32>,
    %c41 = arith.constant 41 : index
    %174 = memref.load %arg1[%c41] : memref<64xi32, #tpu.memory_space<smem>>
    %175 = arith.index_cast %174 : i32 to index
    %c0_126 = arith.constant 0 : index
    %176 = vector.load %arg3[%175, %c0_126] : memref<512x64xf32, #tpu.memory_space<vmem>>, vector<1x64xf32>
    %c41_127 = arith.constant 41 : index
    %c0_128 = arith.constant 0 : index
    %177 = vector.load %arg7[%c41_127, %c0_128] : memref<64x64xf32, #tpu.memory_space<vmem>>, vector<1x64xf32>
    tpu.vector_store %arg7[%c41_127, %c0_128], %176 {strides = array<i32>} : memref<64x64xf32, #tpu.memory_space<vmem>>, vector<1x64xf32>,
    %c42 = arith.constant 42 : index
    %178 = memref.load %arg1[%c42] : memref<64xi32, #tpu.memory_space<smem>>
    %179 = arith.index_cast %178 : i32 to index
    %c0_129 = arith.constant 0 : index
    %180 = vector.load %arg3[%179, %c0_129] : memref<512x64xf32, #tpu.memory_space<vmem>>, vector<1x64xf32>
    %c42_130 = arith.constant 42 : index
    %c0_131 = arith.constant 0 : index
    %181 = vector.load %arg7[%c42_130, %c0_131] : memref<64x64xf32, #tpu.memory_space<vmem>>, vector<1x64xf32>
    tpu.vector_store %arg7[%c42_130, %c0_131], %180 {strides = array<i32>} : memref<64x64xf32, #tpu.memory_space<vmem>>, vector<1x64xf32>,
    %c43 = arith.constant 43 : index
    %182 = memref.load %arg1[%c43] : memref<64xi32, #tpu.memory_space<smem>>
    %183 = arith.index_cast %182 : i32 to index
    %c0_132 = arith.constant 0 : index
    %184 = vector.load %arg3[%183, %c0_132] : memref<512x64xf32, #tpu.memory_space<vmem>>, vector<1x64xf32>
    %c43_133 = arith.constant 43 : index
    %c0_134 = arith.constant 0 : index
    %185 = vector.load %arg7[%c43_133, %c0_134] : memref<64x64xf32, #tpu.memory_space<vmem>>, vector<1x64xf32>
    tpu.vector_store %arg7[%c43_133, %c0_134], %184 {strides = array<i32>} : memref<64x64xf32, #tpu.memory_space<vmem>>, vector<1x64xf32>,
    %c44 = arith.constant 44 : index
    %186 = memref.load %arg1[%c44] : memref<64xi32, #tpu.memory_space<smem>>
    %187 = arith.index_cast %186 : i32 to index
    %c0_135 = arith.constant 0 : index
    %188 = vector.load %arg3[%187, %c0_135] : memref<512x64xf32, #tpu.memory_space<vmem>>, vector<1x64xf32>
    %c44_136 = arith.constant 44 : index
    %c0_137 = arith.constant 0 : index
    %189 = vector.load %arg7[%c44_136, %c0_137] : memref<64x64xf32, #tpu.memory_space<vmem>>, vector<1x64xf32>
    tpu.vector_store %arg7[%c44_136, %c0_137], %188 {strides = array<i32>} : memref<64x64xf32, #tpu.memory_space<vmem>>, vector<1x64xf32>,
    %c45 = arith.constant 45 : index
    %190 = memref.load %arg1[%c45] : memref<64xi32, #tpu.memory_space<smem>>
    %191 = arith.index_cast %190 : i32 to index
    %c0_138 = arith.constant 0 : index
    %192 = vector.load %arg3[%191, %c0_138] : memref<512x64xf32, #tpu.memory_space<vmem>>, vector<1x64xf32>
    %c45_139 = arith.constant 45 : index
    %c0_140 = arith.constant 0 : index
    %193 = vector.load %arg7[%c45_139, %c0_140] : memref<64x64xf32, #tpu.memory_space<vmem>>, vector<1x64xf32>
    tpu.vector_store %arg7[%c45_139, %c0_140], %192 {strides = array<i32>} : memref<64x64xf32, #tpu.memory_space<vmem>>, vector<1x64xf32>,
    %c46 = arith.constant 46 : index
    %194 = memref.load %arg1[%c46] : memref<64xi32, #tpu.memory_space<smem>>
    %195 = arith.index_cast %194 : i32 to index
    %c0_141 = arith.constant 0 : index
    %196 = vector.load %arg3[%195, %c0_141] : memref<512x64xf32, #tpu.memory_space<vmem>>, vector<1x64xf32>
    %c46_142 = arith.constant 46 : index
    %c0_143 = arith.constant 0 : index
    %197 = vector.load %arg7[%c46_142, %c0_143] : memref<64x64xf32, #tpu.memory_space<vmem>>, vector<1x64xf32>
    tpu.vector_store %arg7[%c46_142, %c0_143], %196 {strides = array<i32>} : memref<64x64xf32, #tpu.memory_space<vmem>>, vector<1x64xf32>,
    %c47 = arith.constant 47 : index
    %198 = memref.load %arg1[%c47] : memref<64xi32, #tpu.memory_space<smem>>
    %199 = arith.index_cast %198 : i32 to index
    %c0_144 = arith.constant 0 : index
    %200 = vector.load %arg3[%199, %c0_144] : memref<512x64xf32, #tpu.memory_space<vmem>>, vector<1x64xf32>
    %c47_145 = arith.constant 47 : index
    %c0_146 = arith.constant 0 : index
    %201 = vector.load %arg7[%c47_145, %c0_146] : memref<64x64xf32, #tpu.memory_space<vmem>>, vector<1x64xf32>
    tpu.vector_store %arg7[%c47_145, %c0_146], %200 {strides = array<i32>} : memref<64x64xf32, #tpu.memory_space<vmem>>, vector<1x64xf32>,
    %c48 = arith.constant 48 : index
    %202 = memref.load %arg1[%c48] : memref<64xi32, #tpu.memory_space<smem>>
    %203 = arith.index_cast %202 : i32 to index
    %c0_147 = arith.constant 0 : index
    %204 = vector.load %arg3[%203, %c0_147] : memref<512x64xf32, #tpu.memory_space<vmem>>, vector<1x64xf32>
    %c48_148 = arith.constant 48 : index
    %c0_149 = arith.constant 0 : index
    %205 = vector.load %arg7[%c48_148, %c0_149] : memref<64x64xf32, #tpu.memory_space<vmem>>, vector<1x64xf32>
    tpu.vector_store %arg7[%c48_148, %c0_149], %204 {strides = array<i32>} : memref<64x64xf32, #tpu.memory_space<vmem>>, vector<1x64xf32>,
    %c49 = arith.constant 49 : index
    %206 = memref.load %arg1[%c49] : memref<64xi32, #tpu.memory_space<smem>>
    %207 = arith.index_cast %206 : i32 to index
    %c0_150 = arith.constant 0 : index
    %208 = vector.load %arg3[%207, %c0_150] : memref<512x64xf32, #tpu.memory_space<vmem>>, vector<1x64xf32>
    %c49_151 = arith.constant 49 : index
    %c0_152 = arith.constant 0 : index
    %209 = vector.load %arg7[%c49_151, %c0_152] : memref<64x64xf32, #tpu.memory_space<vmem>>, vector<1x64xf32>
    tpu.vector_store %arg7[%c49_151, %c0_152], %208 {strides = array<i32>} : memref<64x64xf32, #tpu.memory_space<vmem>>, vector<1x64xf32>,
    %c50 = arith.constant 50 : index
    %210 = memref.load %arg1[%c50] : memref<64xi32, #tpu.memory_space<smem>>
    %211 = arith.index_cast %210 : i32 to index
    %c0_153 = arith.constant 0 : index
    %212 = vector.load %arg3[%211, %c0_153] : memref<512x64xf32, #tpu.memory_space<vmem>>, vector<1x64xf32>
    %c50_154 = arith.constant 50 : index
    %c0_155 = arith.constant 0 : index
    %213 = vector.load %arg7[%c50_154, %c0_155] : memref<64x64xf32, #tpu.memory_space<vmem>>, vector<1x64xf32>
    tpu.vector_store %arg7[%c50_154, %c0_155], %212 {strides = array<i32>} : memref<64x64xf32, #tpu.memory_space<vmem>>, vector<1x64xf32>,
    %c51 = arith.constant 51 : index
    %214 = memref.load %arg1[%c51] : memref<64xi32, #tpu.memory_space<smem>>
    %215 = arith.index_cast %214 : i32 to index
    %c0_156 = arith.constant 0 : index
    %216 = vector.load %arg3[%215, %c0_156] : memref<512x64xf32, #tpu.memory_space<vmem>>, vector<1x64xf32>
    %c51_157 = arith.constant 51 : index
    %c0_158 = arith.constant 0 : index
    %217 = vector.load %arg7[%c51_157, %c0_158] : memref<64x64xf32, #tpu.memory_space<vmem>>, vector<1x64xf32>
    tpu.vector_store %arg7[%c51_157, %c0_158], %216 {strides = array<i32>} : memref<64x64xf32, #tpu.memory_space<vmem>>, vector<1x64xf32>,
    %c52 = arith.constant 52 : index
    %218 = memref.load %arg1[%c52] : memref<64xi32, #tpu.memory_space<smem>>
    %219 = arith.index_cast %218 : i32 to index
    %c0_159 = arith.constant 0 : index
    %220 = vector.load %arg3[%219, %c0_159] : memref<512x64xf32, #tpu.memory_space<vmem>>, vector<1x64xf32>
    %c52_160 = arith.constant 52 : index
    %c0_161 = arith.constant 0 : index
    %221 = vector.load %arg7[%c52_160, %c0_161] : memref<64x64xf32, #tpu.memory_space<vmem>>, vector<1x64xf32>
    tpu.vector_store %arg7[%c52_160, %c0_161], %220 {strides = array<i32>} : memref<64x64xf32, #tpu.memory_space<vmem>>, vector<1x64xf32>,
    %c53 = arith.constant 53 : index
    %222 = memref.load %arg1[%c53] : memref<64xi32, #tpu.memory_space<smem>>
    %223 = arith.index_cast %222 : i32 to index
    %c0_162 = arith.constant 0 : index
    %224 = vector.load %arg3[%223, %c0_162] : memref<512x64xf32, #tpu.memory_space<vmem>>, vector<1x64xf32>
    %c53_163 = arith.constant 53 : index
    %c0_164 = arith.constant 0 : index
    %225 = vector.load %arg7[%c53_163, %c0_164] : memref<64x64xf32, #tpu.memory_space<vmem>>, vector<1x64xf32>
    tpu.vector_store %arg7[%c53_163, %c0_164], %224 {strides = array<i32>} : memref<64x64xf32, #tpu.memory_space<vmem>>, vector<1x64xf32>,
    %c54 = arith.constant 54 : index
    %226 = memref.load %arg1[%c54] : memref<64xi32, #tpu.memory_space<smem>>
    %227 = arith.index_cast %226 : i32 to index
    %c0_165 = arith.constant 0 : index
    %228 = vector.load %arg3[%227, %c0_165] : memref<512x64xf32, #tpu.memory_space<vmem>>, vector<1x64xf32>
    %c54_166 = arith.constant 54 : index
    %c0_167 = arith.constant 0 : index
    %229 = vector.load %arg7[%c54_166, %c0_167] : memref<64x64xf32, #tpu.memory_space<vmem>>, vector<1x64xf32>
    tpu.vector_store %arg7[%c54_166, %c0_167], %228 {strides = array<i32>} : memref<64x64xf32, #tpu.memory_space<vmem>>, vector<1x64xf32>,
    %c55 = arith.constant 55 : index
    %230 = memref.load %arg1[%c55] : memref<64xi32, #tpu.memory_space<smem>>
    %231 = arith.index_cast %230 : i32 to index
    %c0_168 = arith.constant 0 : index
    %232 = vector.load %arg3[%231, %c0_168] : memref<512x64xf32, #tpu.memory_space<vmem>>, vector<1x64xf32>
    %c55_169 = arith.constant 55 : index
    %c0_170 = arith.constant 0 : index
    %233 = vector.load %arg7[%c55_169, %c0_170] : memref<64x64xf32, #tpu.memory_space<vmem>>, vector<1x64xf32>
    tpu.vector_store %arg7[%c55_169, %c0_170], %232 {strides = array<i32>} : memref<64x64xf32, #tpu.memory_space<vmem>>, vector<1x64xf32>,
    %c56 = arith.constant 56 : index
    %234 = memref.load %arg1[%c56] : memref<64xi32, #tpu.memory_space<smem>>
    %235 = arith.index_cast %234 : i32 to index
    %c0_171 = arith.constant 0 : index
    %236 = vector.load %arg3[%235, %c0_171] : memref<512x64xf32, #tpu.memory_space<vmem>>, vector<1x64xf32>
    %c56_172 = arith.constant 56 : index
    %c0_173 = arith.constant 0 : index
    %237 = vector.load %arg7[%c56_172, %c0_173] : memref<64x64xf32, #tpu.memory_space<vmem>>, vector<1x64xf32>
    tpu.vector_store %arg7[%c56_172, %c0_173], %236 {strides = array<i32>} : memref<64x64xf32, #tpu.memory_space<vmem>>, vector<1x64xf32>,
    %c57 = arith.constant 57 : index
    %238 = memref.load %arg1[%c57] : memref<64xi32, #tpu.memory_space<smem>>
    %239 = arith.index_cast %238 : i32 to index
    %c0_174 = arith.constant 0 : index
    %240 = vector.load %arg3[%239, %c0_174] : memref<512x64xf32, #tpu.memory_space<vmem>>, vector<1x64xf32>
    %c57_175 = arith.constant 57 : index
    %c0_176 = arith.constant 0 : index
    %241 = vector.load %arg7[%c57_175, %c0_176] : memref<64x64xf32, #tpu.memory_space<vmem>>, vector<1x64xf32>
    tpu.vector_store %arg7[%c57_175, %c0_176], %240 {strides = array<i32>} : memref<64x64xf32, #tpu.memory_space<vmem>>, vector<1x64xf32>,
    %c58 = arith.constant 58 : index
    %242 = memref.load %arg1[%c58] : memref<64xi32, #tpu.memory_space<smem>>
    %243 = arith.index_cast %242 : i32 to index
    %c0_177 = arith.constant 0 : index
    %244 = vector.load %arg3[%243, %c0_177] : memref<512x64xf32, #tpu.memory_space<vmem>>, vector<1x64xf32>
    %c58_178 = arith.constant 58 : index
    %c0_179 = arith.constant 0 : index
    %245 = vector.load %arg7[%c58_178, %c0_179] : memref<64x64xf32, #tpu.memory_space<vmem>>, vector<1x64xf32>
    tpu.vector_store %arg7[%c58_178, %c0_179], %244 {strides = array<i32>} : memref<64x64xf32, #tpu.memory_space<vmem>>, vector<1x64xf32>,
    %c59 = arith.constant 59 : index
    %246 = memref.load %arg1[%c59] : memref<64xi32, #tpu.memory_space<smem>>
    %247 = arith.index_cast %246 : i32 to index
    %c0_180 = arith.constant 0 : index
    %248 = vector.load %arg3[%247, %c0_180] : memref<512x64xf32, #tpu.memory_space<vmem>>, vector<1x64xf32>
    %c59_181 = arith.constant 59 : index
    %c0_182 = arith.constant 0 : index
    %249 = vector.load %arg7[%c59_181, %c0_182] : memref<64x64xf32, #tpu.memory_space<vmem>>, vector<1x64xf32>
    tpu.vector_store %arg7[%c59_181, %c0_182], %248 {strides = array<i32>} : memref<64x64xf32, #tpu.memory_space<vmem>>, vector<1x64xf32>,
    %c60 = arith.constant 60 : index
    %250 = memref.load %arg1[%c60] : memref<64xi32, #tpu.memory_space<smem>>
    %251 = arith.index_cast %250 : i32 to index
    %c0_183 = arith.constant 0 : index
    %252 = vector.load %arg3[%251, %c0_183] : memref<512x64xf32, #tpu.memory_space<vmem>>, vector<1x64xf32>
    %c60_184 = arith.constant 60 : index
    %c0_185 = arith.constant 0 : index
    %253 = vector.load %arg7[%c60_184, %c0_185] : memref<64x64xf32, #tpu.memory_space<vmem>>, vector<1x64xf32>
    tpu.vector_store %arg7[%c60_184, %c0_185], %252 {strides = array<i32>} : memref<64x64xf32, #tpu.memory_space<vmem>>, vector<1x64xf32>,
    %c61 = arith.constant 61 : index
    %254 = memref.load %arg1[%c61] : memref<64xi32, #tpu.memory_space<smem>>
    %255 = arith.index_cast %254 : i32 to index
    %c0_186 = arith.constant 0 : index
    %256 = vector.load %arg3[%255, %c0_186] : memref<512x64xf32, #tpu.memory_space<vmem>>, vector<1x64xf32>
    %c61_187 = arith.constant 61 : index
    %c0_188 = arith.constant 0 : index
    %257 = vector.load %arg7[%c61_187, %c0_188] : memref<64x64xf32, #tpu.memory_space<vmem>>, vector<1x64xf32>
    tpu.vector_store %arg7[%c61_187, %c0_188], %256 {strides = array<i32>} : memref<64x64xf32, #tpu.memory_space<vmem>>, vector<1x64xf32>,
    %c62 = arith.constant 62 : index
    %258 = memref.load %arg1[%c62] : memref<64xi32, #tpu.memory_space<smem>>
    %259 = arith.index_cast %258 : i32 to index
    %c0_189 = arith.constant 0 : index
    %260 = vector.load %arg3[%259, %c0_189] : memref<512x64xf32, #tpu.memory_space<vmem>>, vector<1x64xf32>
    %c62_190 = arith.constant 62 : index
    %c0_191 = arith.constant 0 : index
    %261 = vector.load %arg7[%c62_190, %c0_191] : memref<64x64xf32, #tpu.memory_space<vmem>>, vector<1x64xf32>
    tpu.vector_store %arg7[%c62_190, %c0_191], %260 {strides = array<i32>} : memref<64x64xf32, #tpu.memory_space<vmem>>, vector<1x64xf32>,
    %c63 = arith.constant 63 : index
    %262 = memref.load %arg1[%c63] : memref<64xi32, #tpu.memory_space<smem>>
    %263 = arith.index_cast %262 : i32 to index
    %c0_192 = arith.constant 0 : index
    %264 = vector.load %arg3[%263, %c0_192] : memref<512x64xf32, #tpu.memory_space<vmem>>, vector<1x64xf32>
    %c63_193 = arith.constant 63 : index
    %c0_194 = arith.constant 0 : index
    %265 = vector.load %arg7[%c63_193, %c0_194] : memref<64x64xf32, #tpu.memory_space<vmem>>, vector<1x64xf32>
    tpu.vector_store %arg7[%c63_193, %c0_194], %264 {strides = array<i32>} : memref<64x64xf32, #tpu.memory_space<vmem>>, vector<1x64xf32>,
    %c0_195 = arith.constant 0 : index
    %c0_196 = arith.constant 0 : index
    %266 = vector.load %arg7[%c0_195, %c0_196] : memref<64x64xf32, #tpu.memory_space<vmem>>, vector<64x64xf32>
    %267 = vector.shape_cast %266 : vector<64x64xf32> to vector<8x8x64xf32>
    %268 = vector.shape_cast %9 : vector<8x8xf32> to vector<8x8x1xf32>
    %269 = vector.broadcast %268 : vector<8x8x1xf32> to vector<8x8x64xf32>
    %270 = arith.mulf %267, %269 : vector<8x8x64xf32>
    %cst_197 = arith.constant dense<0.000000e+00> : vector<8x64xf32>
    %271 = vector.multi_reduction <add>, %270, %cst_197 [1] : vector<8x8x64xf32> to vector<8x64xf32>
    %272 = arith.truncf %271 : vector<8x64xf32> to vector<8x64xbf16>
    %c0_198 = arith.constant 0 : index
    %c0_199 = arith.constant 0 : index
    %273 = vector.load %arg4[%c0_198, %c0_199] : memref<64x64xbf16, #tpu.memory_space<vmem>>, vector<64x64xbf16>
    %cst_200 = arith.constant dense<0.000000e+00> : vector<8x64xf32>
    %274 = tpu.matmul %272, %273, %cst_200 {dimension_numbers = #tpu.dot_dimension_numbers<[1], [0], [0], [1], [0, 0, 1, 1], [], []>} : vector<8x64xbf16>, vector<64x64xbf16>, vector<8x64xf32> -> vector<8x64xf32>
    %275 = arith.truncf %274 : vector<8x64xf32> to vector<8x64xbf16>
    %c0_201 = arith.constant 0 : index
    %c0_202 = arith.constant 0 : index
    %276 = vector.load %arg5[%c0_201, %c0_202] : memref<64x128xbf16, #tpu.memory_space<vmem>>, vector<64x128xbf16>
    %cst_203 = arith.constant dense<0.000000e+00> : vector<8x128xf32>
    %277 = tpu.matmul %275, %276, %cst_203 {dimension_numbers = #tpu.dot_dimension_numbers<[1], [0], [0], [1], [0, 0, 1, 1], [], []>} : vector<8x64xbf16>, vector<64x128xbf16>, vector<8x128xf32> -> vector<8x128xf32>
    %c0_204 = arith.constant 0 : index
    %c0_205 = arith.constant 0 : index
    %278 = vector.load %arg6[%c0_204, %c0_205] : memref<8x128xf32, #tpu.memory_space<vmem>>, vector<8x128xf32>
    tpu.vector_store %arg6[%c0_204, %c0_205], %277 {strides = array<i32>} : memref<8x128xf32, #tpu.memory_space<vmem>>, vector<8x128xf32>,
    return
  }
  func.func @transform_0(%arg0: i32, %arg1: memref<64xi32, #tpu.memory_space<smem>>) -> (i32, i32) {
    %c0_i32 = arith.constant 0 : i32
    %c0_i32_0 = arith.constant 0 : i32
    %c0_i32_1 = arith.constant 0 : i32
    return %c0_i32, %c0_i32_0 : i32, i32
  }
  func.func @transform_1(%arg0: i32, %arg1: memref<64xi32, #tpu.memory_space<smem>>) -> (i32, i32) {
    %c0_i32 = arith.constant 0 : i32
    %c0_i32_0 = arith.constant 0 : i32
    %c0_i32_1 = arith.constant 0 : i32
    return %c0_i32, %c0_i32_0 : i32, i32
  }
  func.func @transform_2(%arg0: i32, %arg1: memref<64xi32, #tpu.memory_space<smem>>) -> (i32, i32) {
    %c0_i32 = arith.constant 0 : i32
    %c0_i32_0 = arith.constant 0 : i32
    %c0_i32_1 = arith.constant 0 : i32
    return %c0_i32, %c0_i32_0 : i32, i32
  }
  func.func @transform_3(%arg0: i32, %arg1: memref<64xi32, #tpu.memory_space<smem>>) -> (i32, i32) {
    %c0_i32 = arith.constant 0 : i32
    %c0_i32_0 = arith.constant 0 : i32
    return %c0_i32, %arg0 : i32, i32
  }
  func.func @transform_4(%arg0: i32, %arg1: memref<64xi32, #tpu.memory_space<smem>>) -> (i32, i32) {
    %c0_i32 = arith.constant 0 : i32
    %c0_i32_0 = arith.constant 0 : i32
    return %c0_i32, %arg0 : i32, i32
  }
}

</mosaic_0001>

<bundles_post_ra>
// kernel: tpu_custom_call.1
= control target key start
LH: loop header
LB: loop body
LE: loop exit
PB: predicated region body
PF: predicated region fallthrough
CT: control target
= control target key end

     0   :  { %s1803_s0 = inlined_call_operand.vmem [shape: s32[64], index: 0, kind: input, shape index: {}]   ;;  %s1804_s1 = inlined_call_operand.vmem [shape: f32[8,8], index: 1, kind: input, shape index: {}]   ;;  %s1805_s2 = inlined_call_operand.vmem [shape: f32[512,64], index: 2, kind: input, shape index: {}]   ;;  %s1806_s3 = inlined_call_operand.vmem [shape: bf16[64,64], index: 3, kind: input, shape index: {}]   ;;  %s1807_s4 = inlined_call_operand.vmem [shape: bf16[64,512], index: 4, kind: input, shape index: {}]   ;;  %s1808_s5 = inlined_call_operand.hbm [shape: f32[8,512], index: 5, kind: output, shape index: {}]  }
   0x1   :  { %1814 = sst [smem:[#allocation14_spill]] %s1804_s1  ;;  %s10_s20 = sshll.u32 %s1803_s0, 4  ;;  %s11_s20 = int_to_ptr.vmem [resolvable:$true] %s10_s20 }
   0x2   :  { %1815 = sst [smem:[#allocation15_spill]] %s1807_s4  ;;  %s1179_s21 = scalar_lea.vmem %s11_s20, 16 }
   0x3   :  { %p1180_p0 = scmp.ne.s32.totalorder %s11_s20, %s1179_s21  ;;  %p1184_p1 = scmp.lt.s32.totalorder %s11_s20, %s11_s20 }
   0x4   :  { %p1185_p2 = scmp.lt.s32.totalorder %s1179_s21, %s1179_s21 }
   0x6   :  { %p1186_p3 = por %p1185_p2, %p1184_p1 }
   0x8   :  { %p1187_p4 = pnand %p1186_p3, %p1180_p0 }
   0xa   :  { %1190 = shalt.err (!%p1187_p4)  }
   0xb   :  { %s1257_s22 = smov [#allocation4]  }
   0xc   :  { %13 = dma.vmem_to_smem %s11_s20, 16, %s1257_s22, [#allocation3] }
   0xd   :  { %1235 = dma.done.wait [#allocation3], 16 }
   0xe   :  { %1236 = vsyncadd [#allocation3], 4294967280 }
   0xf   :  { %15 = sfence }
  0x10   :  { %16 = vsyncpa [#allocation7], 0 }
  0x11   :  { %18 = vsyncpa [#allocation7 + $0x1], 0  ;;  %s1294_s23 = smov 0   ;;  %s1296_s24 = smov 0  }
  0x12   :  { %s1298_s0 = smov 0   ;;  %s1300_s25 = smov 0  }
  0x13 LB: > { %1816 = sst [smem:[#allocation10_spill]] %s1251_s0  ;;  %s1809_s26 = sadd.s32 4294967295, %s1255_s25   ;;  %s1255_s25 = sphi %s1300_s25, %s1826_s25   ;;  %s1251_s0 = sphi %s1298_s0, %s1828_s0   ;;  %s1247_s24 = sphi %s1296_s24, %s1830_s24   ;;  %s1243_s23 = sphi %s1294_s23, %s1829_s23  }
  0x14   : > { %s1006_s27 = sadd.s32 4294967294, %s1255_s25   ;;  %s1317_s28 = sadd.s32 1, %s1255_s25  }
  0x15   : > { %1817 = sst [smem:[#allocation11_spill]] %s1317_s28  ;;  %s94_s29 = sadd.s32 1, %s1251_s0 }
  0x16   : > { %s91_s30 = ssub.s32 %s1255_s25, %s1317_s28  ;;  %p101_p5 = scmp.ne.s32.totalorder %s1251_s0, %s1247_s24 }
  0x17   : > { %p92_p6 = scmp.eq.s32.totalorder %s91_s30, 0  ;;  %p102_p7 = scmp.eq.s32.totalorder %s1255_s25, 0 }
  0x18   : > { %p131_p8 = scmp.eq.s32.totalorder %s1809_s26, 3  ;;  %p136_p9 = scmp.ne.s32.totalorder %s1247_s24, %s1243_s23 }
  0x19   : > { %s1330_s6 = scalar_select %p92_p6, %s1251_s0, %s94_s29  }
  0x1a   : > { %p103_p10 = por %p102_p7, %p101_p5  ;;  %p1332_p11 = por %p131_p8, %p101_p5 }
  0x1b   : > { %1818 = sst [smem:[#allocation12_spill]] %s1330_s6  ;;  %p137_p12 = scmp.eq.s32.totalorder %s1006_s27, 3 }
  0x1c   : > { %p1008_p0 = scmp.ge.s32.totalorder %s1255_s25, 4 }
  0x1d   : > { %p1336_p13 = por %p137_p12, %p136_p9 }
  0x1e   : > { %162 = sbr.rel (%p1008_p0) target bundleno = 52 (0x34), region = 28 }
  0x1f   : > { %s1820_s8 = scalar_select %p1336_p13, 1, 0 }
  0x21   : > { %1821 = sst [smem:[#allocation13_spill]] %s1820_s8 }
  0x25   : > { %165 = sbr.rel (!%p103_p10) target bundleno = 52 (0x34), region = 32  ;;  %s167_s9 = sand.u32 (%p103_p10), 1, %s1251_s0  }
  0x26   : > { %s1010_s10 = sshll.u32 (%p103_p10), %s1255_s25, 2  ;;  %s1009_s11 = sshll.u32 (%p103_p10), %s167_s9, 5 }
  0x27   : > { %s1822_s4 = sld [smem:[#allocation15_spill]] (%p103_p10)  ;;  %s169_s15 = scalar_lea.vmem (%p103_p10), [#allocation5], %s1009_s11 }
  0x2d   : > { %s171_s14 = scalar_lea.vmem %s1822_s4, %s1010_s10 }
  0x2e   : > { %v187_v0 = vld [vmem:[%s171_s14] sm:$0xf]  ;;  %v189_v1 = vld [vmem:[%s171_s14 + $0x10] sm:$0xf] }
  0x2f   : > { %188 = vst [vmem:[%s169_s15] sm:$0xf] %v187_v0  ;;  %190 = vst [vmem:[%s169_s15 + $0x4] sm:$0xf] %v189_v1  ;;  %v191_v2 = vld [vmem:[%s171_s14 + $0x20] sm:$0xf] }
  0x30   : > { %v193_v3 = vld [vmem:[%s171_s14 + $0x30] sm:$0xf]  ;;  %v195_v4 = vld [vmem:[%s171_s14 + $0x40] sm:$0xf]  ;;  %192 = vst [vmem:[%s169_s15 + $0x8] sm:$0xf] %v191_v2 }
  0x31   : > { %194 = vst [vmem:[%s169_s15 + $0xc] sm:$0xf] %v193_v3  ;;  %196 = vst [vmem:[%s169_s15 + $0x10] sm:$0xf] %v195_v4  ;;  %v197_v5 = vld [vmem:[%s171_s14 + $0x50] sm:$0xf] }
  0x32   : > { %v199_v6 = vld [vmem:[%s171_s14 + $0x60] sm:$0xf]  ;;  %v201_v7 = vld [vmem:[%s171_s14 + $0x70] sm:$0xf]  ;;  %198 = vst [vmem:[%s169_s15 + $0x14] sm:$0xf] %v197_v5 }
  0x33   : > { %200 = vst [vmem:[%s169_s15 + $0x18] sm:$0xf] %v199_v6  ;;  %202 = vst [vmem:[%s169_s15 + $0x1c] sm:$0xf] %v201_v7 }
  0x34 PF: > { %p1011_p1 = scmp.ge.s32.totalorder %s1255_s25, 1  ;;  %p240_p2 = scmp.lt.s32.totalorder %s1255_s25, 5 }
  0x36   : > { %p241_p3 = pnand %p1011_p1, %p240_p2 }
  0x37   : > { %s1823_s1 = sld [smem:[#allocation14_spill]] (!%p241_p3)  ;;  %vm274_vm0 = vcmask (!%p241_p3), 64512   ;;  %s1030_s19 = sld [smem:[#allocation4 + $0x11]] (!%p241_p3)  ;;  %vm289_vm1 = vcmask (!%p241_p3), 516096   ;;  %v551_v36 = vlaneseq (!%p241_p3)  ;;  %vm1259_vm2 = vmmov (!%p241_p3), 0  }
  0x38   : > { %244 = sbr.rel (%p241_p3) target bundleno = 980 (0x3d4), region = 73  ;;  %s1029_s18 = sld [smem:[#allocation4 + $0x10]] (!%p241_p3)  ;;  %vm615_vm3 = vcmask (!%p241_p3), 523264   ;;  %vm704_vm4 = vcmask (!%p241_p3), 1041409   ;;  %vm706_vm5 = vcmask (!%p241_p3), 1042434   ;;  %vm708_vm6 = vcmask (!%p241_p3), 1043459  }
  0x39   : > { %s1031_s20 = sld [smem:[#allocation4 + $0x12]] (!%p241_p3)  ;;  %s1032_s21 = sld [smem:[#allocation4 + $0x13]] (!%p241_p3)  ;;  %v1454_v37 = vshrl.u32 (!%p241_p3), %v551_v36, 7  ;;  %vm710_vm7 = vcmask (!%p241_p3), 1044484   ;;  %vm712_vm8 = vcmask (!%p241_p3), 1045509   ;;  %vm714_vm9 = vcmask (!%p241_p3), 1046534  }
  0x3a   : > { %s1033_s22 = sld [smem:[#allocation4 + $0x14]] (!%p241_p3)  ;;  %s1034_s27 = sld [smem:[#allocation4 + $0x15]] (!%p241_p3)  ;;  %vm716_vm10 = vcmask (!%p241_p3), 1047559  }
  0x3b   : > { %s1035_s29 = sld [smem:[#allocation4 + $0x16]] (!%p241_p3)  ;;  %s1036_s30 = sld [smem:[#allocation4 + $0x17]] (!%p241_p3)  ;;  %v567_v43 = vsub.s32 (!%p241_p3), 2, %v1454_v37  ;;  %v553_v44 = vsub.s32 (!%p241_p3), 0, %v1454_v37  ;;  %v560_v56 = vsub.s32 (!%p241_p3), 1, %v1454_v37  ;;  %v574_v58 = vsub.s32 (!%p241_p3), 3, %v1454_v37 }
  0x3c   : > { %s1016_s15 = sld [smem:[#allocation4 + $0x3]] (!%p241_p3)  ;;  %s1017_s16 = sld [smem:[#allocation4 + $0x4]] (!%p241_p3)  ;;  %v581_v1 = vsub.s32 (!%p241_p3), 4, %v1454_v37 }
  0x3d   : > { %v273_v8 = vld [vmem:[%s1823_s1] sm:$0xff] (!%p241_p3)  ;;  %s356_s14 = scalar_lea.vmem (!%p241_p3), %s1805_s2, %s1030_s19  ;;  %s1386_s9 = sld [smem:[#allocation4 + $0x8]] (!%p241_p3) }
  0x3e   : > { %v275_v9 = vsel (!%p241_p3), %vm274_vm0, %v273_v8, -inf  ;;  %s352_s11 = scalar_lea.vmem (!%p241_p3), %s1805_s2, %s1029_s18  ;;  %v357_v16 = vld [vmem:[%s356_s14] sm:$0x1] (!%p241_p3)  ;;  %s1015_s14 = sld [smem:[#allocation4 + $0x2]] (!%p241_p3) }
  0x3f   : > { %276 = vmax.xlane.f32.xlu0 %v275_v9  ;;  %v353_v15 = vld [vmem:[%s352_s11] sm:$0x1]  ;;  %s360_s17 = scalar_lea.vmem %s1805_s2, %s1031_s20  ;;  %s364_s4 = scalar_lea.vmem %s1805_s2, %s1032_s21  ;;  %358 = vst.msk [vmem:[#allocation2 + $0x11] sm:$0x1] %vm289_vm1, %v357_v16 }
  0x40   : > { %354 = vst.msk [vmem:[#allocation2 + $0x10] sm:$0x1] %vm289_vm1, %v353_v15  ;;  %v361_v17 = vld [vmem:[%s360_s17] sm:$0x1]  ;;  %s368_s19 = scalar_lea.vmem %s1805_s2, %s1033_s22  ;;  %s372_s12 = scalar_lea.vmem %s1805_s2, %s1034_s27 }
  0x41   : > { %v365_v18 = vld [vmem:[%s364_s4] sm:$0x1]  ;;  %362 = vst.msk [vmem:[#allocation2 + $0x12] sm:$0x1] %vm289_vm1, %v361_v17  ;;  %s376_s20 = scalar_lea.vmem %s1805_s2, %s1035_s29  ;;  %s380_s13 = scalar_lea.vmem %s1805_s2, %s1036_s30 }
  0x42   : > { %366 = vst.msk [vmem:[#allocation2 + $0x13] sm:$0x1] %vm289_vm1, %v365_v18  ;;  %v369_v19 = vld [vmem:[%s368_s19] sm:$0x1]  ;;  %s286_s22 = sld [smem:[#allocation4]]  ;;  %s1014_s27 = sld [smem:[#allocation4 + $0x1]] }
  0x43   : > { %v373_v20 = vld [vmem:[%s372_s12] sm:$0x1]  ;;  %370 = vst.msk [vmem:[#allocation2 + $0x14] sm:$0x1] %vm289_vm1, %v369_v19  ;;  %s1018_s29 = sld [smem:[#allocation4 + $0x5]]  ;;  %s1019_s17 = sld [smem:[#allocation4 + $0x6]] }
  0x44   : > { %374 = vst.msk [vmem:[#allocation2 + $0x15] sm:$0x1] %vm289_vm1, %v373_v20  ;;  %v377_v21 = vld [vmem:[%s376_s20] sm:$0x1]  ;;  %s1020_s18 = sld [smem:[#allocation4 + $0x7]]  ;;  %s1388_s30 = sld [smem:[#allocation4 + $0x9]] }
  0x45   : > { %v381_v22 = vld [vmem:[%s380_s13] sm:$0x1]  ;;  %378 = vst.msk [vmem:[#allocation2 + $0x16] sm:$0x1] %vm289_vm1, %v377_v21  ;;  %s1390_s19 = sld [smem:[#allocation4 + $0xa]]  ;;  %s1392_s10 = sld [smem:[#allocation4 + $0xb]] }
  0x46   : > { %382 = vst.msk [vmem:[#allocation2 + $0x17] sm:$0x1] %vm289_vm1, %v381_v22  ;;  %s296_s6 = scalar_lea.vmem %s1805_s2, %s1015_s14  ;;  %s300_s8 = scalar_lea.vmem %s1805_s2, %s1016_s15  ;;  %v1167_v17 = vld [vmem:[%s1806_s3] sm:$0xff]   ;;  %v602_v19 = vsub.s32 7, %v1454_v37  ;;  %v1258_v22 = vmov 0.0  }
  0x47   : > { %v297_v25 = vld [vmem:[%s296_s6] sm:$0x1]  ;;  %s304_s11 = scalar_lea.vmem %s1805_s2, %s1017_s16  ;;  %s320_s20 = scalar_lea.vmem %s1805_s2, %s1386_s9  ;;  %1101 = vmatprep.subr.bf16.mxu0 %v1258_v22  ;;  %1113 = vmatprep.subr.bf16.mxu1 %v1258_v22 }
  0x48   : > { %s287_s1 = scalar_lea.vmem %s1805_s2, %s286_s22  ;;  %s292_s21 = scalar_lea.vmem %s1805_s2, %s1014_s27  ;;  %v301_v26 = vld [vmem:[%s300_s8] sm:$0x1]  ;;  %298 = vst.msk [vmem:[#allocation2 + $0x2] sm:$0x1] %vm289_vm1, %v297_v25  ;;  %1102 = vmatpush3.bf16.msra.mxu0 %v1167_v17  ;;  %1109 = vmatprep.mubr.msk.bf16.mxu0 %vm1259_vm2, %v1258_v22 }
  0x49   : > { %v288_v23 = vld [vmem:[%s287_s1] sm:$0x1]  ;;  %s308_s14 = scalar_lea.vmem %s1805_s2, %s1018_s29  ;;  %302 = vst.msk [vmem:[#allocation2 + $0x3] sm:$0x1] %vm289_vm1, %v301_v26  ;;  %s312_s6 = scalar_lea.vmem %s1805_s2, %s1019_s17  ;;  %1103 = vmatprep.subr.bf16.mxu0 %v1258_v22  ;;  %1121 = vmatprep.mubr.msk.bf16.mxu1 %vm1259_vm2, %v1258_v22 }
  0x4a   : > { %v293_v24 = vld [vmem:[%s292_s21] sm:$0x1]  ;;  %290 = vst.msk [vmem:[#allocation2] sm:$0x1] %vm289_vm1, %v288_v23  ;;  %s316_s16 = scalar_lea.vmem %s1805_s2, %s1020_s18  ;;  %s324_s13 = scalar_lea.vmem %s1805_s2, %s1388_s30 }
  0x4b   : > { %294 = vst.msk [vmem:[#allocation2 + $0x1] sm:$0x1] %vm289_vm1, %v293_v24  ;;  %v305_v27 = vld [vmem:[%s304_s11] sm:$0x1]  ;;  %s328_s22 = scalar_lea.vmem %s1805_s2, %s1390_s19  ;;  %s332_s12 = scalar_lea.vmem %s1805_s2, %s1392_s10 }
  0x4c   : > { %v309_v28 = vld [vmem:[%s308_s14] sm:$0x1]  ;;  %306 = vst.msk [vmem:[#allocation2 + $0x4] sm:$0x1] %vm289_vm1, %v305_v27  ;;  %s1025_s9 = sld [smem:[#allocation4 + $0xc]]  ;;  %s1026_s30 = sld [smem:[#allocation4 + $0xd]] }
  0x4d   : > { %310 = vst.msk [vmem:[#allocation2 + $0x5] sm:$0x1] %vm289_vm1, %v309_v28  ;;  %v313_v29 = vld [vmem:[%s312_s6] sm:$0x1]  ;;  %s1027_s1 = sld [smem:[#allocation4 + $0xe]]  ;;  %s1028_s19 = sld [smem:[#allocation4 + $0xf]] }
  0x4e   : > { %v317_v30 = vld [vmem:[%s316_s16] sm:$0x1]  ;;  %314 = vst.msk [vmem:[#allocation2 + $0x6] sm:$0x1] %vm289_vm1, %v313_v29  ;;  %s1037_s14 = sld [smem:[#allocation4 + $0x18]]  ;;  %s1038_s0 = sld [smem:[#allocation4 + $0x19]] }
  0x4f   : > { %318 = vst.msk [vmem:[#allocation2 + $0x7] sm:$0x1] %vm289_vm1, %v317_v30  ;;  %v321_v31 = vld [vmem:[%s320_s20] sm:$0x1]  ;;  %s1039_s10 = sld [smem:[#allocation4 + $0x1a]]  ;;  %s1446_s28 = sld [smem:[#allocation4 + $0x1b]] }
  0x50   : > { %v325_v32 = vld [vmem:[%s324_s13] sm:$0x1]  ;;  %322 = vst.msk [vmem:[#allocation2 + $0x8] sm:$0x1] %vm289_vm1, %v321_v31  ;;  %s1448_s6 = sld [smem:[#allocation4 + $0x1c]]  ;;  %s1450_s8 = sld [smem:[#allocation4 + $0x1d]] }
  0x51   : > { %326 = vst.msk [vmem:[#allocation2 + $0x9] sm:$0x1] %vm289_vm1, %v325_v32  ;;  %v329_v34 = vld [vmem:[%s328_s22] sm:$0x1]  ;;  %s1452_s15 = sld [smem:[#allocation4 + $0x1e]]  ;;  %s1459_s20 = sld [smem:[#allocation4 + $0x1f]] }
  0x52   : > { %v333_v35 = vld [vmem:[%s332_s12] sm:$0x1]  ;;  %330 = vst.msk [vmem:[#allocation2 + $0xa] sm:$0x1] %vm289_vm1, %v329_v34  ;;  %s336_s26 = scalar_lea.vmem %s1805_s2, %s1025_s9  ;;  %s340_s13 = scalar_lea.vmem %s1805_s2, %s1026_s30  ;;  %v1168_v30 = vld [vmem:[%s1806_s3 + $0x8] sm:$0xff]   ;;  %v1169_v31 = vld [vmem:[%s1806_s3 + $0x10] sm:$0xff]  }
  0x53   : > { %334 = vst.msk [vmem:[#allocation2 + $0xb] sm:$0x1] %vm289_vm1, %v333_v35  ;;  %v337_v38 = vld [vmem:[%s336_s26] sm:$0x1]  ;;  %s344_s22 = scalar_lea.vmem %s1805_s2, %s1027_s1  ;;  %s348_s12 = scalar_lea.vmem %s1805_s2, %s1028_s19  ;;  %1104 = vmatpush3.bf16.msra.mxu0 %v1168_v30 }
  0x54   : > { %338 = vst.msk [vmem:[#allocation2 + $0xc] sm:$0x1] %vm289_vm1, %v337_v38  ;;  %v341_v39 = vld [vmem:[%s340_s13] sm:$0x1]  ;;  %s384_s29 = scalar_lea.vmem %s1805_s2, %s1037_s14  ;;  %s388_s26 = scalar_lea.vmem %s1805_s2, %s1038_s0  ;;  %1105 = vmatprep.subr.bf16.mxu0 %v1258_v22 }
  0x55   : > { %v345_v40 = vld [vmem:[%s344_s22] sm:$0x1]  ;;  %342 = vst.msk [vmem:[#allocation2 + $0xd] sm:$0x1] %vm289_vm1, %v341_v39  ;;  %s392_s19 = scalar_lea.vmem %s1805_s2, %s1039_s10  ;;  %s396_s0 = scalar_lea.vmem %s1805_s2, %s1446_s28 }
  0x56   : > { %346 = vst.msk [vmem:[#allocation2 + $0xe] sm:$0x1] %vm289_vm1, %v345_v40  ;;  %v349_v41 = vld [vmem:[%s348_s12] sm:$0x1]  ;;  %s400_s22 = scalar_lea.vmem %s1805_s2, %s1448_s6  ;;  %s404_s11 = scalar_lea.vmem %s1805_s2, %s1450_s8 }
  0x57   : > { %v385_v42 = vld [vmem:[%s384_s29] sm:$0x1]  ;;  %350 = vst.msk [vmem:[#allocation2 + $0xf] sm:$0x1] %vm289_vm1, %v349_v41  ;;  %s408_s16 = scalar_lea.vmem %s1805_s2, %s1452_s15  ;;  %s412_s29 = scalar_lea.vmem %s1805_s2, %s1459_s20  ;;  %1106 = vmatpush3.bf16.msra.mxu0 %v1169_v31 }
  0x58   : > { %386 = vst.msk [vmem:[#allocation2 + $0x18] sm:$0x1] %vm289_vm1, %v385_v42  ;;  %v389_v45 = vld [vmem:[%s388_s26] sm:$0x1]  ;;  %s1045_s30 = sld [smem:[#allocation4 + $0x20]]  ;;  %s1046_s8 = sld [smem:[#allocation4 + $0x21]]  ;;  %1107 = vmatprep.subr.bf16.mxu0 %v1258_v22 }
  0x59   : > { %v393_v46 = vld [vmem:[%s392_s19] sm:$0x1]  ;;  %390 = vst.msk [vmem:[#allocation2 + $0x19] sm:$0x1] %vm289_vm1, %v389_v45  ;;  %s1047_s15 = sld [smem:[#allocation4 + $0x22]]  ;;  %s1048_s1 = sld [smem:[#allocation4 + $0x23]] }
  0x5a   : > { %394 = vst.msk [vmem:[#allocation2 + $0x1a] sm:$0x1] %vm289_vm1, %v393_v46  ;;  %v397_v48 = vld [vmem:[%s396_s0] sm:$0x1]  ;;  %s1049_s26 = sld [smem:[#allocation4 + $0x24]]  ;;  %s1519_s21 = sld [smem:[#allocation4 + $0x25]] }
  0x5b   : > { %v401_v49 = vld [vmem:[%s400_s22] sm:$0x1]  ;;  %398 = vst.msk [vmem:[#allocation2 + $0x1b] sm:$0x1] %vm289_vm1, %v397_v48  ;;  %s1521_s20 = sld [smem:[#allocation4 + $0x26]]  ;;  %s1523_s4 = sld [smem:[#allocation4 + $0x27]] }
  0x5c   : > { %402 = vst.msk [vmem:[#allocation2 + $0x1c] sm:$0x1] %vm289_vm1, %v401_v49  ;;  %v405_v51 = vld [vmem:[%s404_s11] sm:$0x1]  ;;  %s1525_s19 = sld [smem:[#allocation4 + $0x28]]  ;;  %s1527_s14 = sld [smem:[#allocation4 + $0x29]] }
  0x5d   : > { %v409_v52 = vld [vmem:[%s408_s16] sm:$0x1]  ;;  %406 = vst.msk [vmem:[#allocation2 + $0x1d] sm:$0x1] %vm289_vm1, %v405_v51  ;;  %s1529_s13 = sld [smem:[#allocation4 + $0x2a]]  ;;  %s1536_s22 = sld [smem:[#allocation4 + $0x2b]] }
  0x5e   : > { %410 = vst.msk [vmem:[#allocation2 + $0x1e] sm:$0x1] %vm289_vm1, %v409_v52  ;;  %v413_v53 = vld [vmem:[%s412_s29] sm:$0x1]  ;;  %s416_s18 = scalar_lea.vmem %s1805_s2, %s1045_s30  ;;  %s420_s11 = scalar_lea.vmem %s1805_s2, %s1046_s8  ;;  %v545_v45 = vld [vmem:[#allocation2 + $0x10] sm:$0xff] }
  0x5f   : > { %414 = vst.msk [vmem:[#allocation2 + $0x1f] sm:$0x1] %vm289_vm1, %v413_v53  ;;  %v417_v59 = vld [vmem:[%s416_s18] sm:$0x1]  ;;  %s424_s16 = scalar_lea.vmem %s1805_s2, %s1047_s15  ;;  %s428_s29 = scalar_lea.vmem %s1805_s2, %s1048_s1 }
  0x60   : > { %418 = vst.msk [vmem:[#allocation2 + $0x20] sm:$0x1] %vm289_vm1, %v417_v59  ;;  %v421_v60 = vld [vmem:[%s420_s11] sm:$0x1]  ;;  %s432_s17 = scalar_lea.vmem %s1805_s2, %s1049_s26  ;;  %s436_s18 = scalar_lea.vmem %s1805_s2, %s1519_s21 }
  0x61   : > { %v425_v61 = vld [vmem:[%s424_s16] sm:$0x1]  ;;  %422 = vst.msk [vmem:[#allocation2 + $0x21] sm:$0x1] %vm289_vm1, %v421_v60  ;;  %s440_s1 = scalar_lea.vmem %s1805_s2, %s1521_s20  ;;  %s444_s12 = scalar_lea.vmem %s1805_s2, %s1523_s4 }
  0x62   : > { %426 = vst.msk [vmem:[#allocation2 + $0x22] sm:$0x1] %vm289_vm1, %v425_v61  ;;  %v429_v62 = vld [vmem:[%s428_s29] sm:$0x1]  ;;  %s448_s16 = scalar_lea.vmem %s1805_s2, %s1525_s19  ;;  %s452_s6 = scalar_lea.vmem %s1805_s2, %s1527_s14 }
  0x63   : > { %v433_v63 = vld [vmem:[%s432_s17] sm:$0x1]  ;;  %430 = vst.msk [vmem:[#allocation2 + $0x23] sm:$0x1] %vm289_vm1, %v429_v62  ;;  %s456_s0 = scalar_lea.vmem %s1805_s2, %s1529_s13  ;;  %s460_s17 = scalar_lea.vmem %s1805_s2, %s1536_s22 }
  0x64   : > { %434 = vst.msk [vmem:[#allocation2 + $0x24] sm:$0x1] %vm289_vm1, %v433_v63  ;;  %v437_v2 = vld [vmem:[%s436_s18] sm:$0x1]  ;;  %s1057_s14 = sld [smem:[#allocation4 + $0x2c]]  ;;  %s1058_s8 = sld [smem:[#allocation4 + $0x2d]] }
  0x65   : > { %v441_v3 = vld [vmem:[%s440_s1] sm:$0x1]  ;;  %438 = vst.msk [vmem:[#allocation2 + $0x25] sm:$0x1] %vm289_vm1, %v437_v2  ;;  %s1059_s13 = sld [smem:[#allocation4 + $0x2e]]  ;;  %s1060_s15 = sld [smem:[#allocation4 + $0x2f]] }
  0x66   : > { %442 = vst.msk [vmem:[#allocation2 + $0x26] sm:$0x1] %vm289_vm1, %v441_v3  ;;  %v445_v4 = vld [vmem:[%s444_s12] sm:$0x1]  ;;  %s1594_s18 = sld [smem:[#allocation4 + $0x30]]  ;;  %s1596_s10 = sld [smem:[#allocation4 + $0x31]] }
  0x67   : > { %v449_v5 = vld [vmem:[%s448_s16] sm:$0x1]  ;;  %446 = vst.msk [vmem:[#allocation2 + $0x27] sm:$0x1] %vm289_vm1, %v445_v4  ;;  %s1598_s22 = sld [smem:[#allocation4 + $0x32]]  ;;  %s1600_s27 = sld [smem:[#allocation4 + $0x33]] }
  0x68   : > { %450 = vst.msk [vmem:[#allocation2 + $0x28] sm:$0x1] %vm289_vm1, %v449_v5  ;;  %v453_v6 = vld [vmem:[%s452_s6] sm:$0x1]  ;;  %s1602_s1 = sld [smem:[#allocation4 + $0x34]]  ;;  %s1604_s26 = sld [smem:[#allocation4 + $0x35]] }
  0x69   : > { %v457_v7 = vld [vmem:[%s456_s0] sm:$0x1]  ;;  %454 = vst.msk [vmem:[#allocation2 + $0x29] sm:$0x1] %vm289_vm1, %v453_v6  ;;  %s1608_s11 = sld [smem:[#allocation4 + $0x36]]  ;;  %s1610_s12 = sld [smem:[#allocation4 + $0x37]] }
  0x6a   : > { %458 = vst.msk [vmem:[#allocation2 + $0x2a] sm:$0x1] %vm289_vm1, %v457_v7  ;;  %s464_s16 = scalar_lea.vmem %s1805_s2, %s1057_s14  ;;  %s468_s6 = scalar_lea.vmem %s1805_s2, %s1058_s8 }
  0x6b   : > { %s472_s0 = scalar_lea.vmem %s1805_s2, %s1059_s13  ;;  %s1260_s28 = smov [#allocation6]  }
  0x6c   : > { %v473_v15 = vld [vmem:[%s472_s0] sm:$0x1]  ;;  %s480_s21 = scalar_lea.vmem %s1805_s2, %s1594_s18  ;;  %s484_s20 = scalar_lea.vmem %s1805_s2, %s1596_s10 }
  0x6d   : > { %474 = vst.msk [vmem:[#allocation2 + $0x2e] sm:$0x1] %vm289_vm1, %v473_v15  ;;  %v481_v20 = vld [vmem:[%s480_s21] sm:$0x1]  ;;  %s488_s10 = scalar_lea.vmem %s1805_s2, %s1598_s22  ;;  %s492_s30 = scalar_lea.vmem %s1805_s2, %s1600_s27 }
  0x6e   : > { %v485_v21 = vld [vmem:[%s484_s20] sm:$0x1]  ;;  %482 = vst.msk [vmem:[#allocation2 + $0x30] sm:$0x1] %vm289_vm1, %v481_v20  ;;  %s496_s22 = scalar_lea.vmem %s1805_s2, %s1602_s1  ;;  %s500_s27 = scalar_lea.vmem %s1805_s2, %s1604_s26 }
  0x6f   : > { %486 = vst.msk [vmem:[#allocation2 + $0x31] sm:$0x1] %vm289_vm1, %v485_v21  ;;  %v489_v23 = vld [vmem:[%s488_s10] sm:$0x1]  ;;  %s504_s21 = scalar_lea.vmem %s1805_s2, %s1608_s11  ;;  %s508_s1 = scalar_lea.vmem %s1805_s2, %s1610_s12 }
  0x70   : > { %v493_v24 = vld [vmem:[%s492_s30] sm:$0x1]  ;;  %490 = vst.msk [vmem:[#allocation2 + $0x32] sm:$0x1] %vm289_vm1, %v489_v23  ;;  %s1069_s26 = sld [smem:[#allocation4 + $0x38]]  ;;  %s1070_s11 = sld [smem:[#allocation4 + $0x39]] }
  0x71   : > { %494 = vst.msk [vmem:[#allocation2 + $0x33] sm:$0x1] %vm289_vm1, %v493_v24  ;;  %v497_v25 = vld [vmem:[%s496_s22] sm:$0x1]  ;;  %s1071_s20 = sld [smem:[#allocation4 + $0x3a]]  ;;  %s1072_s12 = sld [smem:[#allocation4 + $0x3b]] }
  0x72   : > { %v501_v26 = vld [vmem:[%s500_s27] sm:$0x1]  ;;  %498 = vst.msk [vmem:[#allocation2 + $0x34] sm:$0x1] %vm289_vm1, %v497_v25  ;;  %s1680_s18 = sld [smem:[#allocation4 + $0x3d]]  ;;  %s1682_s10 = sld [smem:[#allocation4 + $0x3e]] }
  0x73   : > { %502 = vst.msk [vmem:[#allocation2 + $0x35] sm:$0x1] %vm289_vm1, %v501_v26  ;;  %v505_v27 = vld [vmem:[%s504_s21] sm:$0x1] }
  0x74   : > { %v509_v28 = vld [vmem:[%s508_s1] sm:$0x1]  ;;  %506 = vst.msk [vmem:[#allocation2 + $0x36] sm:$0x1] %vm289_vm1, %v505_v27 }
  0x75   : > { %510 = vst.msk [vmem:[#allocation2 + $0x37] sm:$0x1] %vm289_vm1, %v509_v28 }
  0x76   : > { %s512_s22 = scalar_lea.vmem %s1805_s2, %s1069_s26  ;;  %s516_s27 = scalar_lea.vmem %s1805_s2, %s1070_s11 }
  0x77   : > { %v513_v32 = vld [vmem:[%s512_s22] sm:$0x1]  ;;  %s520_s21 = scalar_lea.vmem %s1805_s2, %s1071_s20  ;;  %s524_s13 = scalar_lea.vmem %s1805_s2, %s1072_s12 }
  0x78   : > { %514 = vst.msk [vmem:[#allocation2 + $0x38] sm:$0x1] %vm289_vm1, %v513_v32  ;;  %v517_v34 = vld [vmem:[%s516_s27] sm:$0x1]  ;;  %s532_s12 = scalar_lea.vmem %s1805_s2, %s1680_s18  ;;  %s1732_s18 = sand.u32 1, %s1247_s24  }
  0x79   : > { %v521_v35 = vld [vmem:[%s520_s21] sm:$0x1]  ;;  %518 = vst.msk [vmem:[#allocation2 + $0x39] sm:$0x1] %vm289_vm1, %v517_v34  ;;  %s1824_s21 = sadd.s32 4294967295, %s1255_s25  }
  0x7a   : > { %522 = vst.msk [vmem:[#allocation2 + $0x3a] sm:$0x1] %vm289_vm1, %v521_v35  ;;  %v525_v36 = vld [vmem:[%s524_s13] sm:$0x1]  ;;  %s1088_s9 = sshll.u32 %s1824_s21, 7  ;;  %s864_s13 = scalar_lea.sflag [#allocation7], %s1732_s18 }
  0x7b   : > { %526 = vst.msk [vmem:[#allocation2 + $0x3b] sm:$0x1] %vm289_vm1, %v525_v36  ;;  %v533_v38 = vld [vmem:[%s532_s12] sm:$0x1]  ;;  %s1762_s26 = scalar_lea.hbm %s1808_s5, %s1088_s9 }
  0x7c   : > { %534 = vst.msk [vmem:[#allocation2 + $0x3d] sm:$0x1] %vm289_vm1, %v533_v38 }
  0xcc   : > { %v277_v10 = vpop.xlane.xlu0 %276 }
  0xcd   : > { %v278_v11 = vsub.f32 %v273_v8, %v277_v10  ;;  %v461_v8 = vld [vmem:[%s460_s17] sm:$0x1]  ;;  %v588_v10 = vsub.s32 5, %v1454_v37  ;;  %s476_s17 = scalar_lea.vmem %s1805_s2, %s1060_s15  ;;  %s1073_s15 = sld [smem:[#allocation4 + $0x3c]] }
  0xce   : > { %462 = vst.msk [vmem:[#allocation2 + $0x2b] sm:$0x1] %vm289_vm1, %v461_v8  ;;  %v477_v16 = vld [vmem:[%s476_s17] sm:$0x1] }
  0xcf   : > { %v279_v12 = vmul.f32 1.442695, %v278_v11  ;;  %478 = vst.msk [vmem:[#allocation2 + $0x2f] sm:$0x1] %vm289_vm1, %v477_v16 }
  0xd1   : > { %1175 = vpow2.f32 %v279_v12  ;;  %v595_v12 = vsub.s32 6, %v1454_v37 }
  0xd3   : > { %s528_s29 = scalar_lea.vmem %s1805_s2, %s1073_s15  ;;  %s536_s15 = scalar_lea.vmem %s1805_s2, %s1682_s10 }
  0xd4   : > { %v529_v37 = vld [vmem:[%s528_s29] sm:$0x1]  ;;  %s1012_s10 = sshll.u32 %s1732_s18, 5  ;;  %s1195_s29 = sshll.u32 %s1260_s28, 4  ;;  %s1196_s29 = int_to_ptr.vmem [resolvable:$false] %s1195_s29 }
  0xd5   : > { %530 = vst.msk [vmem:[#allocation2 + $0x3c] sm:$0x1] %vm289_vm1, %v529_v37  ;;  %v537_v39 = vld [vmem:[%s536_s15] sm:$0x1]  ;;  %s1735_s27 = scalar_lea.vmem [#allocation5], %s1012_s10  ;;  %s1197_s20 = scalar_lea.vmem %s1196_s29, 256 }
  0xd6   : > { %538 = vst.msk [vmem:[#allocation2 + $0x3e] sm:$0x1] %vm289_vm1, %v537_v39  ;;  %v1171_v41 = vld [vmem:[%s1735_s27] sm:$0xff]   ;;  %v1172_v42 = vld [vmem:[%s1735_s27 + $0x8] sm:$0xff]  }
  0xd7   : > { %1114 = vmatpush3.bf16.msra.mxu1 %v1171_v41 }
  0xd8   : > { %1115 = vmatprep.subr.bf16.mxu1 %v1258_v22 }
  0xdb   : > { %v1351_v13 = vpop.eup %1175  ;;  %1116 = vmatpush3.bf16.msra.mxu1 %v1172_v42 }
  0xdc   : > { %v281_v14 = vsel %vm274_vm0, %v1351_v13, 0.0  ;;  %1117 = vmatprep.subr.bf16.mxu1 %v1258_v22 }
  0xdd   : > { %282 = vadd.xlane.f32.xlu0 %v281_v14  ;;  %v469_v14 = vld [vmem:[%s468_s6] sm:$0x1]  ;;  %s1684_s6 = sld [smem:[#allocation4 + $0x3f]] }
  0xde   : > { %470 = vst.msk [vmem:[#allocation2 + $0x2d] sm:$0x1] %vm289_vm1, %v469_v14 }
  0xe3   : > { %s540_s17 = scalar_lea.vmem %s1805_s2, %s1684_s6  ;;  %s1013_s6 = sshll.u32 %s1732_s18, 3 }
  0xe4   : > { %v541_v40 = vld [vmem:[%s540_s17] sm:$0x1]  ;;  %s271_s14 = scalar_lea.vmem [#allocation6], %s1013_s6 }
  0xe5   : > { %542 = vst.msk [vmem:[#allocation2 + $0x3f] sm:$0x1] %vm289_vm1, %v541_v40  ;;  %s877_s8 = sshll.u32 %s271_s14, 4  ;;  %s1757_s8 = int_to_ptr.vmem [resolvable:$true] %s877_s8 }
  0xe6   : > { %s1191_s11 = scalar_lea.vmem %s1757_s8, 128  ;;  %p1198_p7 = scmp.lt.s32.totalorder %s1757_s8, %s1196_s29 }
  0xe7   : > { %p1192_p4 = scmp.ne.s32.totalorder %s1757_s8, %s1191_s11  ;;  %p1199_p8 = scmp.lt.s32.totalorder %s1197_s20, %s1191_s11 }
  0xe9   : > { %p1193_p5 = pnand %p1192_p4, %p1332_p11  ;;  %p1200_p9 = por %p1199_p8, %p1198_p7 }
  0xeb   : > { %p1194_p6 = pneg %p1193_p5 }
  0xec   : > { %v550_v30 = vld [vmem:[#allocation2 + $0x38] sm:$0xff] }
  0xed   : > { %p1201_p10 = pnand %p1200_p9, %p1194_p6 }
 0x16a   : > { %v283_v33 = vpop.xlane.xlu0 %282 }
 0x16b   : > { %1177 = vrcp.f32 %v283_v33  ;;  %v1170_v33 = vld [vmem:[%s1806_s3 + $0x18] sm:$0xff]  }
 0x16c   : > { %1108 = vmatpush3.bf16.msra.mxu0 %v1170_v33 }
 0x175   : > { %v1178_v47 = vpop.eup %1177 }
 0x176   : > { %v1505_v50 = vmul.f32 %v1178_v47, %v1351_v13  ;;  %v465_v13 = vld [vmem:[%s464_s16] sm:$0x1] }
 0x177   : > { %466 = vst.msk [vmem:[#allocation2 + $0x2c] sm:$0x1] %vm289_vm1, %v465_v13 }
 0x178   : > { %v568_v54 = vrot.slane %v1505_v50, %v567_v43  ;;  %v554_v55 = vrot.slane %v1505_v50, %v553_v44  ;;  %v561_v57 = vrot.slane %v1505_v50, %v560_v56  ;;  %v575_v0 = vrot.slane %v1505_v50, %v574_v58  ;;  %v1173_v43 = vld [vmem:[%s1735_s27 + $0x10] sm:$0xff]   ;;  %v543_v44 = vld [vmem:[#allocation2] sm:$0xff]  ;;  %v546_v56 = vld [vmem:[#allocation2 + $0x18] sm:$0xff] }
 0x179   : > { %v582_v9 = vrot.slane %v1505_v50, %v581_v1  ;;  %v589_v11 = vrot.slane %v1505_v50, %v588_v10  ;;  %v596_v18 = vrot.slane %v1505_v50, %v595_v12  ;;  %v603_v29 = vrot.slane %v1505_v50, %v602_v19  ;;  %1118 = vmatpush3.bf16.msra.mxu1 %v1173_v43  ;;  %v544_v50 = vld [vmem:[#allocation2 + $0x8] sm:$0xff] }
 0x17a   : > { %570 = vbcast.lane.b32.xlu0 %v568_v54, 256  ;;  %556 = vbcast.lane.b32.xlu1 %v554_v55, 256 }
 0x17b   : > { %1119 = vmatprep.subr.bf16.mxu1 %v1258_v22 }
 0x17e   : > { %563 = vbcast.lane.b32.xlu1 %v561_v57, 256 }
 0x182   : > { %577 = vbcast.lane.b32.xlu1 %v575_v0, 256  ;;  %v547_v0 = vld [vmem:[#allocation2 + $0x20] sm:$0xff] }
 0x186   : > { %584 = vbcast.lane.b32.xlu1 %v582_v9, 256  ;;  %v548_v9 = vld [vmem:[#allocation2 + $0x28] sm:$0xff] }
 0x18a   : > { %591 = vbcast.lane.b32.xlu1 %v589_v11, 256 }
 0x18e   : > { %598 = vbcast.lane.b32.xlu1 %v596_v18, 256  ;;  %v549_v18 = vld [vmem:[#allocation2 + $0x30] sm:$0xff] }
 0x192   : > { %605 = vbcast.lane.b32.xlu1 %v603_v29, 256 }
 0x1ec   : > { %v571_v46 = vpop.permute.xlu0 %570  ;;  %v557_v47 = vpop.permute.xlu1 %556 }
 0x1ed   : > { %v607_v48 = vmul.f32 %v557_v47, %v543_v44  ;;  %v609_v49 = vmul.f32 %v571_v46, %v545_v45 }
 0x1ef   : > { %v616_v51 = vsel %vm615_vm3, %v607_v48, 0.0  ;;  %v630_v54 = vsel %vm615_vm3, %v609_v49, 0.0 }
 0x1f0   : > { %v564_v52 = vpop.permute.xlu1 %563  ;;  %v617_v55 = vrot.slane %v616_v51, 4  ;;  %v631_v60 = vrot.slane %v630_v54, 4 }
 0x1f1   : > { %v608_v53 = vmul.f32 %v564_v52, %v544_v50 }
 0x1f2   : > { %v618_v62 = vadd.f32 %v617_v55, %v616_v51  ;;  %v632_v5 = vadd.f32 %v631_v60, %v630_v54 }
 0x1f3   : > { %v623_v57 = vsel %vm615_vm3, %v608_v53, 0.0 }
 0x1f4   : > { %v624_v58 = vrot.slane %v623_v57, 4  ;;  %v578_v59 = vpop.permute.xlu1 %577  ;;  %v619_v7 = vrot.slane %v618_v62, 2  ;;  %v633_v14 = vrot.slane %v632_v5, 2 }
 0x1f5   : > { %v610_v61 = vmul.f32 %v578_v59, %v546_v56 }
 0x1f6   : > { %v625_v63 = vadd.f32 %v624_v58, %v623_v57  ;;  %v620_v17 = vadd.f32 %v619_v7, %v618_v62  ;;  %v634_v25 = vadd.f32 %v633_v14, %v632_v5 }
 0x1f7   : > { %v637_v1 = vsel %vm615_vm3, %v610_v61, 0.0 }
 0x1f8   : > { %v626_v2 = vrot.slane %v625_v63, 2  ;;  %v638_v3 = vrot.slane %v637_v1, 4  ;;  %v585_v4 = vpop.permute.xlu1 %584  ;;  %v621_v28 = vrot.slane %v620_v17, 1  ;;  %v635_v38 = vrot.slane %v634_v25, 1 }
 0x1f9   : > { %v611_v6 = vmul.f32 %v585_v4, %v547_v0 }
 0x1fa   : > { %v639_v8 = vadd.f32 %v638_v3, %v637_v1  ;;  %v627_v10 = vadd.f32 %v626_v2, %v625_v63  ;;  %v622_v41 = vadd.f32 %v621_v28, %v620_v17  ;;  %v636_v50 = vadd.f32 %v635_v38, %v634_v25 }
 0x1fb   : > { %v644_v11 = vsel %vm615_vm3, %v611_v6, 0.0 }
 0x1fc   : > { %v640_v12 = vrot.slane %v639_v8, 2  ;;  %v592_v13 = vpop.permute.xlu1 %591  ;;  %v645_v15 = vrot.slane %v644_v11, 4  ;;  %v628_v19 = vrot.slane %v627_v10, 1  ;;  %v672_v52 = vpack.c.bf16 %v622_v41, %v622_v41 }
 0x1fd   : > { %v612_v16 = vmul.f32 %v592_v13, %v548_v9  ;;  %v674_v60 = vpack.c.bf16 %v636_v50, %v636_v50 }
 0x1fe   : > { %v646_v20 = vadd.f32 %v645_v15, %v644_v11  ;;  %v641_v22 = vadd.f32 %v640_v12, %v639_v8  ;;  %v629_v31 = vadd.f32 %v628_v19, %v627_v10  ;;  %v696_v62 = vunpack.c.l.b16 %v672_v52 }
 0x1ff   : > { %v651_v21 = vsel %vm615_vm3, %v612_v16, 0.0  ;;  %v698_v6 = vunpack.c.l.b16 %v674_v60 }
 0x200   : > { %v652_v23 = vrot.slane %v651_v21, 4  ;;  %v599_v24 = vpop.permute.xlu1 %598  ;;  %v647_v26 = vrot.slane %v646_v20, 2  ;;  %v642_v34 = vrot.slane %v641_v22, 1  ;;  %v673_v44 = vpack.c.bf16 %v629_v31, %v629_v31 }
 0x201   : > { %v613_v27 = vmul.f32 %v599_v24, %v549_v18 }
 0x202   : > { %v653_v29 = vadd.f32 %v652_v23, %v651_v21  ;;  %v648_v32 = vadd.f32 %v647_v26, %v646_v20  ;;  %v643_v46 = vadd.f32 %v642_v34, %v641_v22  ;;  %v697_v56 = vunpack.c.l.b16 %v673_v44  ;;  %v1174_v20 = vld [vmem:[%s1735_s27 + $0x18] sm:$0xff]  }
 0x203   : > { %v658_v33 = vsel %vm615_vm3, %v613_v27, 0.0  ;;  %1120 = vmatpush3.bf16.msra.mxu1 %v1174_v20 }
 0x204   : > { %v654_v35 = vrot.slane %v653_v29, 2  ;;  %v659_v36 = vrot.slane %v658_v33, 4  ;;  %v606_v37 = vpop.permute.xlu1 %605  ;;  %v649_v39 = vrot.slane %v648_v32, 1  ;;  %v675_v57 = vpack.c.bf16 %v643_v46, %v643_v46 }
 0x205   : > { %v614_v40 = vmul.f32 %v606_v37, %v550_v30  ;;  %v705_v2 = vsel %vm704_vm4, %v697_v56, %v696_v62 }
 0x206   : > { %v655_v42 = vadd.f32 %v654_v35, %v653_v29  ;;  %v660_v43 = vadd.f32 %v659_v36, %v658_v33  ;;  %v650_v51 = vadd.f32 %v649_v39, %v648_v32  ;;  %v699_v3 = vunpack.c.l.b16 %v675_v57 }
 0x207   : > { %v665_v45 = vsel %vm615_vm3, %v614_v40, 0.0  ;;  %v707_v10 = vsel %vm706_vm5, %v698_v6, %v705_v2 }
 0x208   : > { %v656_v47 = vrot.slane %v655_v42, 1  ;;  %v661_v48 = vrot.slane %v660_v43, 2  ;;  %v666_v49 = vrot.slane %v665_v45, 4  ;;  %v676_v61 = vpack.c.bf16 %v650_v51, %v650_v51 }
 0x209   : > { %v709_v12 = vsel %vm708_vm6, %v699_v3, %v707_v10 }
 0x20a   : > { %v657_v53 = vadd.f32 %v656_v47, %v655_v42  ;;  %v662_v54 = vadd.f32 %v661_v48, %v660_v43  ;;  %v667_v55 = vadd.f32 %v666_v49, %v665_v45  ;;  %v700_v7 = vunpack.c.l.b16 %v676_v61 }
 0x20c   : > { %v663_v58 = vrot.slane %v662_v54, 1  ;;  %v668_v59 = vrot.slane %v667_v55, 2  ;;  %v677_v63 = vpack.c.bf16 %v657_v53, %v657_v53  ;;  %v711_v14 = vsel %vm710_vm7, %v700_v7, %v709_v12 }
 0x20e   : > { %v664_v0 = vadd.f32 %v663_v58, %v662_v54  ;;  %v669_v1 = vadd.f32 %v668_v59, %v667_v55  ;;  %v701_v8 = vunpack.c.l.b16 %v677_v63 }
 0x210   : > { %v678_v4 = vpack.c.bf16 %v664_v0, %v664_v0  ;;  %v670_v5 = vrot.slane %v669_v1, 1  ;;  %v713_v16 = vsel %vm712_vm8, %v701_v8, %v711_v14 }
 0x212   : > { %v671_v9 = vadd.f32 %v670_v5, %v669_v1  ;;  %v702_v11 = vunpack.c.l.b16 %v678_v4 }
 0x214   : > { %v679_v13 = vpack.c.bf16 %v671_v9, %v671_v9  ;;  %v715_v17 = vsel %vm714_vm9, %v702_v11, %v713_v16 }
 0x216   : > { %v703_v15 = vunpack.c.l.b16 %v679_v13 }
 0x218   : > { %v717_v18 = vsel %vm716_vm10, %v703_v15, %v715_v17 }
 0x219   : > { %v718_v19 = vpack.c.b16 %v717_v18, %v717_v18 }
 0x21b   : > { %1110 = vmatmul.mubr.msk.bf16.vlgmr.msra.gmra.mrb[0].mxu0 %vm615_vm3, %v718_v19 }
 0x2ee   : > { %v780_v21 = vpop.f32.mrb[0].mxu0 }
 0x2ef   : > { %v786_v22 = vpack.c.bf16 %v780_v21, %v780_v21  ;;  %v1111_v23 = vpop.f32.mrb[1].mxu0 }
 0x2f0   : > { %v783_v24 = vpop.f32.mrb[2].mxu0 }
 0x2f1   : > { %v1112_v25 = vpop.f32.mrb[3].mxu0  ;;  %1122 = vmatmul.mubr.msk.bf16.vlgmr.msra.gmra.mrb[0].mxu1 %vm615_vm3, %v786_v22 }
 0x3c4   : > { %v856_v26 = vpop.f32.mrb[0].mxu1 }
 0x3c5   : > { %862 = vst [vmem:[%s271_s14] sm:$0xff] %v856_v26  ;;  %v1123_v27 = vpop.f32.mrb[1].mxu1 }
 0x3c6   : > { %v859_v28 = vpop.f32.mrb[2].mxu1 }
 0x3c7   : > { %1204 = shalt.err (!%p1201_p10)
}
 0x3c8   : > { %s1205_s30 = scalar_lea.hbm %s1762_s26, 128  ;;  %s1209_s4 = scalar_lea.hbm %s1808_s5, 512 }
 0x3c9   : > { %p1206_p12 = scmp.ne.s32.totalorder %s1762_s26, %s1205_s30  ;;  %p1210_p2 = scmp.lt.u32.totalorder %s1762_s26, %s1808_s5 }
 0x3ca   : > { %p1211_p3 = scmp.lt.u32.totalorder %s1209_s4, %s1205_s30  ;;  %p1213_p5 = scmp.lt.u32.totalorder %s1205_s30, %s1762_s26 }
 0x3cb   : > { %p1207_p0 = pnand %p1206_p12, %p1332_p11 }
 0x3cc   : > { %p1212_p4 = por %p1211_p3, %p1210_p2 }
 0x3cd   : > { %p1208_p1 = pneg %p1207_p0 }
 0x3ce   : > { %p1214_p6 = por %p1213_p5, %p1212_p4 }
 0x3d0   : > { %p1215_p7 = pnand %p1214_p6, %p1208_p1 }
 0x3d2   : > { %1218 = shalt.err (!%p1215_p7)
}
 0x3d3   : > { %1125 = dma.vmem_to_hbm [thread:$0]  (%p1332_p11), %s1757_s8, 128, %s1762_s26, %s864_s13   ;;  %v1124_v29 = vpop.f32.mrb[3].mxu1 }
 0x3d4 PF: > { %p1131_p8 = scmp.ge.s32.totalorder %s1255_s25, 2  ;;  %s889_s17 = sand.u32 1, %s1243_s23  }
 0x3d5   : > { %s890_s18 = scalar_lea.sflag [#allocation7], %s889_s17 }
 0x3d6   : > { %p1128_p9 = pnand %p1131_p8, %p1336_p13 }
 0x3d8   : > { %1238 = dma.done.wait (!%p1128_p9), %s890_s18, 128  }
 0x3d9   : > { %1240 = vsyncadd (!%p1128_p9), %s890_s18, 4294967168  ;;  %s1826_s25 = sld [smem:[#allocation11_spill]]  ;;  %s1827_s10 = sld [smem:[#allocation10_spill]] }
 0x3da   : > { %s1828_s0 = sld [smem:[#allocation12_spill]]  ;;  %s1829_s23 = smov %s1247_s24 }
 0x3df   : > { %p21_p10 = scmp.ge.s32.totalorder %s1826_s25, 6   ;;  %s1830_s24 = smov %s1827_s10 }
 0x3e1   :  { %23 = sbr.rel (!%p21_p10) target bundleno = 19 (0x13), region = 181 }
 0x3e8   :  { %895 = vsyncpa [#allocation7], 1 }
 0x3e9   :  { %897 = vsyncpa [#allocation7 + $0x1], 1 }

</bundles_post_ra>
